<compile_context>
chip_gen: v6e
topology: v6e:2x2x1
jax: 0.10.0
libtpu: 0.0.40
codegen_flags: <defaults>
</compile_context>

<pallas_src>
import functools

import jax
import jax.numpy as jnp
from jax import lax
from jax.experimental import pallas as pl
from jax.experimental.pallas import tpu as pltpu

HEAD_SIZE = 64


# -------- kernel 1: LayerNorm1 + time_shift (roll) + first lerp + tanh(x @ A), one batch/step ----
def _k1_pre_kernel(x_ref, ln1_g_ref, ln1_b_ref, miu_x_ref, A_ref, xn_ref, ba_ref, tA_ref):
    x = x_ref[...]                                              # (T, C) f32
    mu = jnp.mean(x, axis=-1, keepdims=True)
    var = jnp.mean(jnp.square(x - mu), axis=-1, keepdims=True)
    xn = (x - mu) * lax.rsqrt(var + 1e-5) * ln1_g_ref[...] + ln1_b_ref[...]
    # time_shift == ZeroPad2d((0,0,1,-1)): x_prev[t] = xn[t-1], x_prev[0] = 0.
    x_prev = pltpu.roll(xn, shift=1, axis=0)                    # XLU sublane rotate
    row = lax.broadcasted_iota(jnp.int32, xn.shape, 0)
    x_prev = jnp.where(row == 0, 0.0, x_prev)
    ba = x_prev - xn
    xx = xn + ba * miu_x_ref[...]
    xn_ref[...] = xn
    ba_ref[...] = ba
    tA_ref[...] = jnp.tanh(jnp.dot(xx.astype(jnp.bfloat16), A_ref[...],
                                   preferred_element_type=jnp.float32))


# -------- kernel 2: fused ddlerp (live modes only) + decay lora + W_v / W_r + gate lora ----------
def _k2_fused_kernel(tA5_ref, xn_ref, ba_ref, Bw_ref, lam_ref,
                     td_miu_ref, tdA_ref, tdB_ref,
                     WvT_ref, WrT_ref, Wg1_ref, Wg2_ref,
                     r_out, v_out, w_out, g_out):
    xn = xn_ref[...]                                            # (tile, C) f32
    ba = ba_ref[...]

    def ddlerp(mode):
        miu = jnp.dot(tA5_ref[mode].astype(jnp.bfloat16), Bw_ref[mode],
                      preferred_element_type=jnp.float32) + lam_ref[mode]
        return xn + ba * miu

    xw = ddlerp(0)                                              # decay path
    # mode 1 ("k") is dead code in the reference ([r, w, v, w, u] unpack) -- skipped entirely.
    xv = ddlerp(2)
    xr = ddlerp(3)
    xg = ddlerp(4)

    w = td_miu_ref[...] + jnp.dot(
        jnp.tanh(jnp.dot(xw.astype(jnp.bfloat16), tdA_ref[...],
                         preferred_element_type=jnp.float32)).astype(jnp.bfloat16),
        tdB_ref[...], preferred_element_type=jnp.float32)
    w_out[...] = w                                              # raw decay (also used as "k")
    v_out[...] = jnp.dot(xv.astype(jnp.bfloat16), WvT_ref[...],
                         preferred_element_type=jnp.float32)
    r_out[...] = jnp.dot(xr.astype(jnp.bfloat16), WrT_ref[...],
                         preferred_element_type=jnp.float32)
    g_out[...] = jnp.dot(
        jnp.tanh(jnp.dot(xg.astype(jnp.bfloat16), Wg1_ref[...],
                         preferred_element_type=jnp.float32)).astype(jnp.bfloat16),
        Wg2_ref[...], preferred_element_type=jnp.float32)


# -------- kernel 3: chunked WKV-6 scan, grid (B, T//Tc); state (H, D, D) carried in VMEM ---------
def _wkv_kernel(r_ref, v_ref, w_ref, u_ref, y_ref, state_ref, *, n_head, head_size):
    H, D = n_head, head_size
    Tc = r_ref.shape[0]

    @pl.when(pl.program_id(1) == 0)
    def _():
        state_ref[...] = jnp.zeros_like(state_ref)

    r = r_ref[...]                                              # (Tc, C) f32
    v = v_ref[...]
    w = w_ref[...]
    u = u_ref[...]                                              # (H, D)
    ti = lax.broadcasted_iota(jnp.int32, (Tc, Tc), 0)
    si = lax.broadcasted_iota(jnp.int32, (Tc, Tc), 1)
    incl = (si <= ti).astype(jnp.float32)                       # inclusive-cumsum operator
    causal = ti > si                                            # strictly-causal mask

    outs = []
    for h in range(H):                                          # static unroll; heads on lanes
        sl = slice(h * D, (h + 1) * D)
        rh, vh, wh = r[:, sl], v[:, sl], w[:, sl]
        kh = wh                                                 # faithful to [r, w, v, w, u]
        a = -jnp.exp(wh)                                        # log decay; decay = exp(-exp(w))
        acum = jnp.dot(incl, a, preferred_element_type=jnp.float32)   # inclusive cumsum over t
        excl = acum - a                                         # exclusive cumsum (<= 0)
        S = state_ref[h]                                        # (D_v, D_k) transposed carry
        q = rh * jnp.exp(excl)
        # contribution of history before this chunk
        y_hist = lax.dot_general(q, S, (((1,), (1,)), ((), ())),
                                 preferred_element_type=jnp.float32)     # (Tc, D_v)
        # intra-chunk strictly-causal term (exponents bounded by chunk length)
        kk = kh * jnp.exp(-acum)
        scores = lax.dot_general(q, kk, (((1,), (1,)), ((), ())),
                                 preferred_element_type=jnp.float32)     # (Tc, Tc)
        scores = jnp.where(causal, scores, 0.0)
        y_intra = jnp.dot(scores, vh, preferred_element_type=jnp.float32)
        diag = jnp.sum(rh * u[h:h + 1, :] * kh, axis=-1, keepdims=True)  # bonus on current token
        outs.append(y_hist + y_intra + diag * vh)
        # state carry to next chunk: S'[j,i] = exp(A_tot[i])*S[j,i] + sum_s v_s[j] k_s[i] exp(A_tot[i]-acum_s[i])
        a_tot = acum[Tc - 1:Tc, :]                              # (1, D)
        kdec = kh * jnp.exp(a_tot - acum)
        state_ref[h] = S * jnp.exp(a_tot) + lax.dot_general(
            vh, kdec, (((0,), (0,)), ((), ())), preferred_element_type=jnp.float32)

    y_ref[...] = jnp.concatenate(outs, axis=-1)                 # lane-dense (Tc, C) store


# -------- kernel 4: GroupNorm + gate + W_o + residual + LN2 + squared-ReLU MLP + residual --------
def _k5_post_kernel(y_ref, g_ref, x_ref, gn_w_ref, gn_b_ref, WoT_ref,
                    ln2_g_ref, ln2_b_ref, W1T_ref, W2T_ref, out_ref, *, n_head, head_size):
    H, D = n_head, head_size
    y = y_ref[...]                                              # (tile, C)
    eps = 1e-5 * H                                              # nn.GroupNorm(n_head, C, eps=1e-5*n_head)
    pieces = []
    for h in range(H):                                          # per-head lane-slice stats
        yh = y[:, h * D:(h + 1) * D]
        mu = jnp.mean(yh, axis=-1, keepdims=True)
        var = jnp.mean(jnp.square(yh - mu), axis=-1, keepdims=True)
        pieces.append((yh - mu) * lax.rsqrt(var + eps))
    yn = jnp.concatenate(pieces, axis=-1) * gn_w_ref[...] + gn_b_ref[...]
    o = jnp.dot((yn * g_ref[...]).astype(jnp.bfloat16), WoT_ref[...],
                preferred_element_type=jnp.float32)
    h1 = x_ref[...] + o                                         # residual 1
    mu = jnp.mean(h1, axis=-1, keepdims=True)
    var = jnp.mean(jnp.square(h1 - mu), axis=-1, keepdims=True)
    m = (h1 - mu) * lax.rsqrt(var + 1e-5) * ln2_g_ref[...] + ln2_b_ref[...]
    hid = jnp.maximum(jnp.dot(m.astype(jnp.bfloat16), W1T_ref[...],
                              preferred_element_type=jnp.float32), 0.0)
    out_ref[...] = h1 + jnp.dot((hid * hid).astype(jnp.bfloat16), W2T_ref[...],
                                preferred_element_type=jnp.float32)


# ---------------------------------- wrapper ----------------------------------
def block_forward(x, p, *, n_head, head_size):
    B, T, C = x.shape
    H, D = n_head, head_size
    BT = B * T

    xn, ba, tA = pl.pallas_call(
        _k1_pre_kernel,
        grid=(B,),
        in_specs=[
            pl.BlockSpec((None, T, C), lambda b: (b, 0, 0)),
            pl.BlockSpec((1, C), lambda b: (0, 0)),
            pl.BlockSpec((1, C), lambda b: (0, 0)),
            pl.BlockSpec((1, C), lambda b: (0, 0)),
            pl.BlockSpec((C, 160), lambda b: (0, 0)),
        ],
        out_specs=[
            pl.BlockSpec((None, T, C), lambda b: (b, 0, 0)),
            pl.BlockSpec((None, T, C), lambda b: (b, 0, 0)),
            pl.BlockSpec((None, T, 160), lambda b: (b, 0, 0)),
        ],
        out_shape=[
            jax.ShapeDtypeStruct((B, T, C), jnp.float32),
            jax.ShapeDtypeStruct((B, T, C), jnp.float32),
            jax.ShapeDtypeStruct((B, T, 160), jnp.float32),
        ],
        compiler_params=pltpu.CompilerParams(dimension_semantics=("parallel",)),
    )(x, p["ln1_g"], p["ln1_b"], p["miu_x"], p["A"])

    # Exact reproduction of `torch.tanh(x @ A).view(5, B*T, 32)` (raw row-major view).
    # The raw view scrambles rows across batch boundaries, so it must stay an XLA reshape;
    # everything downstream of it is fused into one row-parallel kernel.
    tA5 = tA.reshape(5, BT, 32)
    xn_f = xn.reshape(BT, C)
    ba_f = ba.reshape(BT, C)

    tile_bt = min(BT, 256)
    assert BT % tile_bt == 0, "B*T must be divisible by the row tile"
    grid_rows = (BT // tile_bt,)
    row_spec = pl.BlockSpec((tile_bt, C), lambda i: (i, 0))

    r_p, v_p, w_raw, g = pl.pallas_call(
        _k2_fused_kernel,
        grid=grid_rows,
        in_specs=[
            pl.BlockSpec((5, tile_bt, 32), lambda i: (0, i, 0)),
            row_spec, row_spec,
            pl.BlockSpec((5, 32, C), lambda i: (0, 0, 0)),
            pl.BlockSpec((5, 1, C), lambda i: (0, 0, 0)),
            pl.BlockSpec((1, C), lambda i: (0, 0)),
            pl.BlockSpec((C, 64), lambda i: (0, 0)),
            pl.BlockSpec((64, C), lambda i: (0, 0)),
            pl.BlockSpec((C, C), lambda i: (0, 0)),
            pl.BlockSpec((C, C), lambda i: (0, 0)),
            pl.BlockSpec((C, 160), lambda i: (0, 0)),
            pl.BlockSpec((160, C), lambda i: (0, 0)),
        ],
        out_specs=[row_spec] * 4,
        out_shape=[jax.ShapeDtypeStruct((BT, C), jnp.float32)] * 4,
        compiler_params=pltpu.CompilerParams(dimension_semantics=("parallel",)),
    )(tA5, xn_f, ba_f, p["B"], p["lambda_"], p["td_miu"], p["tdA"], p["tdB"],
      p["WvT"], p["WrT"], p["Wg1"], p["Wg2"])

    # WKV recurrence on (B, T, C) directly -- only flat (free) reshapes, no transposes.
    r3 = r_p.reshape(B, T, C)
    v3 = v_p.reshape(B, T, C)
    w3 = w_raw.reshape(B, T, C)
    Tc = min(T, 32)                               # small chunk keeps intra-chunk exponents bounded
    assert T % Tc == 0, "T must be divisible by the WKV chunk size"
    seq_spec = pl.BlockSpec((None, Tc, C), lambda b, c: (b, c, 0))

    y3 = pl.pallas_call(
        functools.partial(_wkv_kernel, n_head=H, head_size=D),
        grid=(B, T // Tc),
        in_specs=[seq_spec, seq_spec, seq_spec,
                  pl.BlockSpec((H, D), lambda b, c: (0, 0))],
        out_specs=seq_spec,
        out_shape=jax.ShapeDtypeStruct((B, T, C), jnp.float32),
        scratch_shapes=[pltpu.VMEM((H, D, D), jnp.float32)],
        compiler_params=pltpu.CompilerParams(
            dimension_semantics=("parallel", "arbitrary")),
    )(r3, v3, w3, p["u"])

    y_f = y3.reshape(BT, C)
    out_f = pl.pallas_call(
        functools.partial(_k5_post_kernel, n_head=H, head_size=D),
        grid=grid_rows,
        in_specs=[row_spec, row_spec, row_spec,
                  pl.BlockSpec((1, C), lambda i: (0, 0)),
                  pl.BlockSpec((1, C), lambda i: (0, 0)),
                  pl.BlockSpec((C, C), lambda i: (0, 0)),
                  pl.BlockSpec((1, C), lambda i: (0, 0)),
                  pl.BlockSpec((1, C), lambda i: (0, 0)),
                  pl.BlockSpec((C, 4 * C), lambda i: (0, 0)),
                  pl.BlockSpec((4 * C, C), lambda i: (0, 0))],
        out_specs=row_spec,
        out_shape=jax.ShapeDtypeStruct((BT, C), jnp.float32),
        compiler_params=pltpu.CompilerParams(dimension_semantics=("parallel",)),
    )(y_f, g, x.reshape(BT, C), p["gn_w"], p["gn_b"], p["WoT"],
      p["ln2_g"], p["ln2_b"], p["W1T"], p["W2T"])

    return out_f.reshape(B, T, C)


# ---------------------------------- parameters ----------------------------------
def make_params(key, C, n_blocks, layer_id, H, D):
    r0 = layer_id / (n_blocks - 1)
    r1 = 1.0 - layer_id / n_blocks
    n = jnp.arange(C, dtype=jnp.float32)
    ddd = n / C
    ks = jax.random.split(key, 11)
    unif = lambda k, shape, lo, hi: jax.random.uniform(k, shape, jnp.float32, lo, hi)
    bf = lambda a: a.astype(jnp.bfloat16)        # matmul weights stored bf16 (MXU-native)
    p = {}
    p["ln1_g"] = jnp.ones((1, C), jnp.float32)
    p["ln1_b"] = jnp.zeros((1, C), jnp.float32)
    p["ln2_g"] = jnp.ones((1, C), jnp.float32)
    p["ln2_b"] = jnp.zeros((1, C), jnp.float32)
    p["gn_w"] = jnp.ones((1, C), jnp.float32)
    p["gn_b"] = jnp.zeros((1, C), jnp.float32)
    p["miu_x"] = (1.0 - ddd ** (0.6 * r1 ** 0.9)).reshape(1, C)
    l_a = 1.0 - ddd ** (0.9 * r1)
    l_c = 1.0 - ddd ** (0.4 * r1)
    l_d = 1.0 - ddd ** (0.2 * r1)
    p["lambda_"] = jnp.stack([l_a, l_a - 0.4 * r0, l_c - 0.6 * r0, l_d, l_d]).reshape(5, 1, C)
    p["A"] = bf(unif(ks[0], (C, 5 * 32), -0.01, 0.01))   # zero-init in source; randomized
    p["B"] = bf(unif(ks[1], (5, 32, C), -0.01, 0.01))
    p["td_miu"] = (-6.0 + 5.5 * (n / (C - 1)) ** (0.85 + 1.0 * r0 ** 0.5)).reshape(1, C)
    p["tdA"] = bf(unif(ks[2], (C, 64), -0.01, 0.01))     # zero-init in source; randomized
    p["tdB"] = bf(unif(ks[3], (64, C), -0.01, 0.01))
    zig = ((n + 1.0) % 3.0 - 1.0) * 0.1
    p["u"] = (r0 * (2.5 - n / (C - 1)) + zig).reshape(H, D)
    br = 0.5 / (C ** 0.5)
    p["WrT"] = bf(unif(ks[4], (C, C), -br, br))          # stored as (in, out): x @ W^T directly
    p["WvT"] = bf(unif(ks[5], (C, C), -br, br))
    p["WoT"] = bf(unif(ks[6], (C, C), -0.01, 0.01))      # zero-init in source; randomized
    p["Wg1"] = bf(unif(ks[7], (C, 160), -0.01, 0.01))
    p["Wg2"] = bf(unif(ks[8], (160, C), -0.01, 0.01))
    bm = 1.0 / (C ** 0.5)
    p["W1T"] = bf(unif(ks[9], (C, 4 * C), -bm, bm))
    p["W2T"] = bf(unif(ks[10], (4 * C, C), -0.01, 0.01)) # zero-init in source; randomized
    return p


if __name__ == "__main__":
    C = 128
    H = C // HEAD_SIZE
    D = HEAD_SIZE
    B, T = 2, 8
    n_blocks, block_id = 4, 1

    key = jax.random.PRNGKey(0)
    kx, kp = jax.random.split(key)
    x = jax.random.normal(kx, (B, T, C), jnp.float32)
    params = make_params(kp, C, n_blocks, block_id, H, D)

    fwd = jax.jit(functools.partial(block_forward, n_head=H, head_size=D))
    y = fwd(x, params)
    y = jax.block_until_ready(y)

    assert y.shape == (B, T, C)
    assert bool(jnp.all(jnp.isfinite(y)))
    print("KERNEL_OK")
</pallas_src>

<mosaic_0001>
module attributes {stable_mosaic.version = 11 : i64} {
  func.func @_k1_pre_kernel(%arg0: i32, %arg1: memref<1x8x128xf32, #tpu.memory_space<vmem>>, %arg2: memref<1x128xf32, #tpu.memory_space<vmem>>, %arg3: memref<1x128xf32, #tpu.memory_space<vmem>>, %arg4: memref<1x128xf32, #tpu.memory_space<vmem>>, %arg5: memref<128x160xbf16, #tpu.memory_space<vmem>>, %arg6: memref<1x8x128xf32, #tpu.memory_space<vmem>>, %arg7: memref<1x8x128xf32, #tpu.memory_space<vmem>>, %arg8: memref<1x8x160xf32, #tpu.memory_space<vmem>>) attributes {dimension_semantics = [#tpu.dimension_semantics<parallel>], iteration_bounds = array<i64: 2>, scalar_prefetch = 0 : i64, scratch_operands = 0 : i64, tpu.core_type = #tpu.core_type<tc>, window_params = [{transform_indices = @transform_0, window_bounds = array<i64: 1, 8, 128>}, {pipeline_mode = #tpu.pipeline_mode<synchronous>, transform_indices = @transform_1, window_bounds = array<i64: 1, 128>}, {pipeline_mode = #tpu.pipeline_mode<synchronous>, transform_indices = @transform_2, window_bounds = array<i64: 1, 128>}, {pipeline_mode = #tpu.pipeline_mode<synchronous>, transform_indices = @transform_3, window_bounds = array<i64: 1, 128>}, {pipeline_mode = #tpu.pipeline_mode<synchronous>, transform_indices = @transform_4, window_bounds = array<i64: 128, 160>}, {transform_indices = @transform_5, window_bounds = array<i64: 1, 8, 128>}, {transform_indices = @transform_6, window_bounds = array<i64: 1, 8, 128>}, {transform_indices = @transform_7, window_bounds = array<i64: 1, 8, 160>}]} {
    %c0 = arith.constant 0 : index
    %c0_0 = arith.constant 0 : index
    %c0_1 = arith.constant 0 : index
    %0 = vector.load %arg1[%c0, %c0_0, %c0_1] : memref<1x8x128xf32, #tpu.memory_space<vmem>>, vector<1x8x128xf32>
    %1 = vector.shape_cast %0 : vector<1x8x128xf32> to vector<8x128xf32>
    %cst = arith.constant dense<0.000000e+00> : vector<8xf32>
    %2 = vector.multi_reduction <add>, %1, %cst [1] : vector<8x128xf32> to vector<8xf32>
    %3 = vector.shape_cast %2 : vector<8xf32> to vector<8x1xf32>
    %cst_2 = arith.constant 1.280000e+02 : f32
    %4 = vector.broadcast %cst_2 : f32 to vector<8x1xf32>
    %5 = arith.divf %3, %4 : vector<8x1xf32>
    %6 = vector.broadcast %5 : vector<8x1xf32> to vector<8x128xf32>
    %7 = arith.subf %1, %6 : vector<8x128xf32>
    %8 = arith.mulf %7, %7 : vector<8x128xf32>
    %cst_3 = arith.constant dense<0.000000e+00> : vector<8xf32>
    %9 = vector.multi_reduction <add>, %8, %cst_3 [1] : vector<8x128xf32> to vector<8xf32>
    %10 = vector.shape_cast %9 : vector<8xf32> to vector<8x1xf32>
    %cst_4 = arith.constant 1.280000e+02 : f32
    %11 = vector.broadcast %cst_4 : f32 to vector<8x1xf32>
    %12 = arith.divf %10, %11 : vector<8x1xf32>
    %13 = vector.broadcast %5 : vector<8x1xf32> to vector<8x128xf32>
    %14 = arith.subf %1, %13 : vector<8x128xf32>
    %cst_5 = arith.constant 9.99999974E-6 : f32
    %15 = vector.broadcast %cst_5 : f32 to vector<8x1xf32>
    %16 = arith.addf %12, %15 : vector<8x1xf32>
    %17 = math.rsqrt %16 : vector<8x1xf32>
    %18 = vector.broadcast %17 : vector<8x1xf32> to vector<8x128xf32>
    %19 = arith.mulf %14, %18 : vector<8x128xf32>
    %c0_6 = arith.constant 0 : index
    %c0_7 = arith.constant 0 : index
    %20 = vector.load %arg2[%c0_6, %c0_7] : memref<1x128xf32, #tpu.memory_space<vmem>>, vector<1x128xf32>
    %21 = vector.broadcast %20 : vector<1x128xf32> to vector<8x128xf32>
    %22 = arith.mulf %19, %21 : vector<8x128xf32>
    %c0_8 = arith.constant 0 : index
    %c0_9 = arith.constant 0 : index
    %23 = vector.load %arg3[%c0_8, %c0_9] : memref<1x128xf32, #tpu.memory_space<vmem>>, vector<1x128xf32>
    %24 = vector.broadcast %23 : vector<1x128xf32> to vector<8x128xf32>
    %25 = arith.addf %22, %24 : vector<8x128xf32>
    %c1_i32 = arith.constant 1 : i32
    %26 = tpu.dynamic_rotate %25 by %c1_i32 dim 0 : vector<8x128xf32>, i32 -> vector<8x128xf32>
    %27 = tpu.iota {dimensions = array<i32: 0>} : vector<8x128xi32>
    %c0_i32 = arith.constant 0 : i32
    %28 = vector.broadcast %c0_i32 : i32 to vector<8x128xi32>
    %29 = arith.cmpi eq, %27, %28 : vector<8x128xi32>
    %cst_10 = arith.constant 0.000000e+00 : f32
    %30 = vector.broadcast %cst_10 : f32 to vector<8x128xf32>
    %31 = arith.select %29, %30, %26 : vector<8x128xi1>, vector<8x128xf32>
    %32 = arith.subf %31, %25 : vector<8x128xf32>
    %c0_11 = arith.constant 0 : index
    %c0_12 = arith.constant 0 : index
    %33 = vector.load %arg4[%c0_11, %c0_12] : memref<1x128xf32, #tpu.memory_space<vmem>>, vector<1x128xf32>
    %34 = vector.broadcast %33 : vector<1x128xf32> to vector<8x128xf32>
    %35 = arith.mulf %32, %34 : vector<8x128xf32>
    %36 = arith.addf %25, %35 : vector<8x128xf32>
    %c0_13 = arith.constant 0 : index
    %c0_14 = arith.constant 0 : index
    %c0_15 = arith.constant 0 : index
    %37 = vector.load %arg6[%c0_13, %c0_14, %c0_15] : memref<1x8x128xf32, #tpu.memory_space<vmem>>, vector<1x8x128xf32>
    %38 = vector.shape_cast %37 : vector<1x8x128xf32> to vector<8x128xf32>
    %39 = vector.shape_cast %25 : vector<8x128xf32> to vector<1x8x128xf32>
    tpu.vector_store %arg6[%c0_13, %c0_14, %c0_15], %39 {strides = array<i32>} : memref<1x8x128xf32, #tpu.memory_space<vmem>>, vector<1x8x128xf32>,
    %c0_16 = arith.constant 0 : index
    %c0_17 = arith.constant 0 : index
    %c0_18 = arith.constant 0 : index
    %40 = vector.load %arg7[%c0_16, %c0_17, %c0_18] : memref<1x8x128xf32, #tpu.memory_space<vmem>>, vector<1x8x128xf32>
    %41 = vector.shape_cast %40 : vector<1x8x128xf32> to vector<8x128xf32>
    %42 = vector.shape_cast %32 : vector<8x128xf32> to vector<1x8x128xf32>
    tpu.vector_store %arg7[%c0_16, %c0_17, %c0_18], %42 {strides = array<i32>} : memref<1x8x128xf32, #tpu.memory_space<vmem>>, vector<1x8x128xf32>,
    %43 = arith.truncf %36 : vector<8x128xf32> to vector<8x128xbf16>
    %c0_19 = arith.constant 0 : index
    %c0_20 = arith.constant 0 : index
    %44 = vector.load %arg5[%c0_19, %c0_20] : memref<128x160xbf16, #tpu.memory_space<vmem>>, vector<128x160xbf16>
    %cst_21 = arith.constant dense<0.000000e+00> : vector<8x160xf32>
    %45 = tpu.matmul %43, %44, %cst_21 {dimension_numbers = #tpu.dot_dimension_numbers<[1], [0], [0], [1], [0, 0, 1, 1], [], []>} : vector<8x128xbf16>, vector<128x160xbf16>, vector<8x160xf32> -> vector<8x160xf32>
    %46 = math.tanh %45 : vector<8x160xf32>
    %c0_22 = arith.constant 0 : index
    %c0_23 = arith.constant 0 : index
    %c0_24 = arith.constant 0 : index
    %47 = vector.load %arg8[%c0_22, %c0_23, %c0_24] : memref<1x8x160xf32, #tpu.memory_space<vmem>>, vector<1x8x160xf32>
    %48 = vector.shape_cast %47 : vector<1x8x160xf32> to vector<8x160xf32>
    %49 = vector.shape_cast %46 : vector<8x160xf32> to vector<1x8x160xf32>
    tpu.vector_store %arg8[%c0_22, %c0_23, %c0_24], %49 {strides = array<i32>} : memref<1x8x160xf32, #tpu.memory_space<vmem>>, vector<1x8x160xf32>,
    return
  }
  func.func @transform_0(%arg0: i32) -> (i32, i32, i32) {
    %c0_i32 = arith.constant 0 : i32
    %c0_i32_0 = arith.constant 0 : i32
    %c0_i32_1 = arith.constant 0 : i32
    return %arg0, %c0_i32, %c0_i32_0 : i32, i32, i32
  }
  func.func @transform_1(%arg0: i32) -> (i32, i32) {
    %c0_i32 = arith.constant 0 : i32
    %c0_i32_0 = arith.constant 0 : i32
    %c0_i32_1 = arith.constant 0 : i32
    return %c0_i32, %c0_i32_0 : i32, i32
  }
  func.func @transform_2(%arg0: i32) -> (i32, i32) {
    %c0_i32 = arith.constant 0 : i32
    %c0_i32_0 = arith.constant 0 : i32
    %c0_i32_1 = arith.constant 0 : i32
    return %c0_i32, %c0_i32_0 : i32, i32
  }
  func.func @transform_3(%arg0: i32) -> (i32, i32) {
    %c0_i32 = arith.constant 0 : i32
    %c0_i32_0 = arith.constant 0 : i32
    %c0_i32_1 = arith.constant 0 : i32
    return %c0_i32, %c0_i32_0 : i32, i32
  }
  func.func @transform_4(%arg0: i32) -> (i32, i32) {
    %c0_i32 = arith.constant 0 : i32
    %c0_i32_0 = arith.constant 0 : i32
    %c0_i32_1 = arith.constant 0 : i32
    return %c0_i32, %c0_i32_0 : i32, i32
  }
  func.func @transform_5(%arg0: i32) -> (i32, i32, i32) {
    %c0_i32 = arith.constant 0 : i32
    %c0_i32_0 = arith.constant 0 : i32
    %c0_i32_1 = arith.constant 0 : i32
    return %arg0, %c0_i32, %c0_i32_0 : i32, i32, i32
  }
  func.func @transform_6(%arg0: i32) -> (i32, i32, i32) {
    %c0_i32 = arith.constant 0 : i32
    %c0_i32_0 = arith.constant 0 : i32
    %c0_i32_1 = arith.constant 0 : i32
    return %arg0, %c0_i32, %c0_i32_0 : i32, i32, i32
  }
  func.func @transform_7(%arg0: i32) -> (i32, i32, i32) {
    %c0_i32 = arith.constant 0 : i32
    %c0_i32_0 = arith.constant 0 : i32
    %c0_i32_1 = arith.constant 0 : i32
    return %arg0, %c0_i32, %c0_i32_0 : i32, i32, i32
  }
}

module attributes {stable_mosaic.version = 11 : i64} {
  func.func @_k5_post_kernel(%arg0: i32, %arg1: memref<16x128xf32, #tpu.memory_space<vmem>>, %arg2: memref<16x128xf32, #tpu.memory_space<vmem>>, %arg3: memref<16x128xf32, #tpu.memory_space<vmem>>, %arg4: memref<1x128xf32, #tpu.memory_space<vmem>>, %arg5: memref<1x128xf32, #tpu.memory_space<vmem>>, %arg6: memref<128x128xbf16, #tpu.memory_space<vmem>>, %arg7: memref<1x128xf32, #tpu.memory_space<vmem>>, %arg8: memref<1x128xf32, #tpu.memory_space<vmem>>, %arg9: memref<128x512xbf16, #tpu.memory_space<vmem>>, %arg10: memref<512x128xbf16, #tpu.memory_space<vmem>>, %arg11: memref<16x128xf32, #tpu.memory_space<vmem>>) attributes {dimension_semantics = [#tpu.dimension_semantics<parallel>], iteration_bounds = array<i64: 1>, scalar_prefetch = 0 : i64, scratch_operands = 0 : i64, tpu.core_type = #tpu.core_type<tc>, window_params = [{transform_indices = @transform_0, window_bounds = array<i64: 16, 128>}, {transform_indices = @transform_1, window_bounds = array<i64: 16, 128>}, {transform_indices = @transform_2, window_bounds = array<i64: 16, 128>}, {pipeline_mode = #tpu.pipeline_mode<synchronous>, transform_indices = @transform_3, window_bounds = array<i64: 1, 128>}, {pipeline_mode = #tpu.pipeline_mode<synchronous>, transform_indices = @transform_4, window_bounds = array<i64: 1, 128>}, {pipeline_mode = #tpu.pipeline_mode<synchronous>, transform_indices = @transform_5, window_bounds = array<i64: 128, 128>}, {pipeline_mode = #tpu.pipeline_mode<synchronous>, transform_indices = @transform_6, window_bounds = array<i64: 1, 128>}, {pipeline_mode = #tpu.pipeline_mode<synchronous>, transform_indices = @transform_7, window_bounds = array<i64: 1, 128>}, {pipeline_mode = #tpu.pipeline_mode<synchronous>, transform_indices = @transform_8, window_bounds = array<i64: 128, 512>}, {pipeline_mode = #tpu.pipeline_mode<synchronous>, transform_indices = @transform_9, window_bounds = array<i64: 512, 128>}, {transform_indices = @transform_10, window_bounds = array<i64: 16, 128>}]} {
    %c0 = arith.constant 0 : index
    %c0_0 = arith.constant 0 : index
    %0 = vector.load %arg1[%c0, %c0_0] : memref<16x128xf32, #tpu.memory_space<vmem>>, vector<16x128xf32>
    %1 = vector.extract_strided_slice %0 {offsets = [0, 0], sizes = [16, 64], strides = [1, 1]} : vector<16x128xf32> to vector<16x64xf32>
    %cst = arith.constant dense<0.000000e+00> : vector<16xf32>
    %2 = vector.multi_reduction <add>, %1, %cst [1] : vector<16x64xf32> to vector<16xf32>
    %3 = vector.shape_cast %2 : vector<16xf32> to vector<16x1xf32>
    %cst_1 = arith.constant 6.400000e+01 : f32
    %4 = vector.broadcast %cst_1 : f32 to vector<16x1xf32>
    %5 = arith.divf %3, %4 : vector<16x1xf32>
    %6 = vector.broadcast %5 : vector<16x1xf32> to vector<16x64xf32>
    %7 = arith.subf %1, %6 : vector<16x64xf32>
    %8 = arith.mulf %7, %7 : vector<16x64xf32>
    %cst_2 = arith.constant dense<0.000000e+00> : vector<16xf32>
    %9 = vector.multi_reduction <add>, %8, %cst_2 [1] : vector<16x64xf32> to vector<16xf32>
    %10 = vector.shape_cast %9 : vector<16xf32> to vector<16x1xf32>
    %cst_3 = arith.constant 6.400000e+01 : f32
    %11 = vector.broadcast %cst_3 : f32 to vector<16x1xf32>
    %12 = arith.divf %10, %11 : vector<16x1xf32>
    %13 = vector.broadcast %5 : vector<16x1xf32> to vector<16x64xf32>
    %14 = arith.subf %1, %13 : vector<16x64xf32>
    %cst_4 = arith.constant 2.000000e-05 : f32
    %15 = vector.broadcast %cst_4 : f32 to vector<16x1xf32>
    %16 = arith.addf %12, %15 : vector<16x1xf32>
    %17 = math.rsqrt %16 : vector<16x1xf32>
    %18 = vector.broadcast %17 : vector<16x1xf32> to vector<16x64xf32>
    %19 = arith.mulf %14, %18 : vector<16x64xf32>
    %20 = vector.extract_strided_slice %0 {offsets = [0, 64], sizes = [16, 64], strides = [1, 1]} : vector<16x128xf32> to vector<16x64xf32>
    %cst_5 = arith.constant dense<0.000000e+00> : vector<16xf32>
    %21 = vector.multi_reduction <add>, %20, %cst_5 [1] : vector<16x64xf32> to vector<16xf32>
    %22 = vector.shape_cast %21 : vector<16xf32> to vector<16x1xf32>
    %cst_6 = arith.constant 6.400000e+01 : f32
    %23 = vector.broadcast %cst_6 : f32 to vector<16x1xf32>
    %24 = arith.divf %22, %23 : vector<16x1xf32>
    %25 = vector.broadcast %24 : vector<16x1xf32> to vector<16x64xf32>
    %26 = arith.subf %20, %25 : vector<16x64xf32>
    %27 = arith.mulf %26, %26 : vector<16x64xf32>
    %cst_7 = arith.constant dense<0.000000e+00> : vector<16xf32>
    %28 = vector.multi_reduction <add>, %27, %cst_7 [1] : vector<16x64xf32> to vector<16xf32>
    %29 = vector.shape_cast %28 : vector<16xf32> to vector<16x1xf32>
    %cst_8 = arith.constant 6.400000e+01 : f32
    %30 = vector.broadcast %cst_8 : f32 to vector<16x1xf32>
    %31 = arith.divf %29, %30 : vector<16x1xf32>
    %32 = vector.broadcast %24 : vector<16x1xf32> to vector<16x64xf32>
    %33 = arith.subf %20, %32 : vector<16x64xf32>
    %cst_9 = arith.constant 2.000000e-05 : f32
    %34 = vector.broadcast %cst_9 : f32 to vector<16x1xf32>
    %35 = arith.addf %31, %34 : vector<16x1xf32>
    %36 = math.rsqrt %35 : vector<16x1xf32>
    %37 = vector.broadcast %36 : vector<16x1xf32> to vector<16x64xf32>
    %38 = arith.mulf %33, %37 : vector<16x64xf32>
    %39 = tpu.concatenate %19, %38 in 1 : vector<16x64xf32>, vector<16x64xf32> -> vector<16x128xf32>
    %c0_10 = arith.constant 0 : index
    %c0_11 = arith.constant 0 : index
    %40 = vector.load %arg4[%c0_10, %c0_11] : memref<1x128xf32, #tpu.memory_space<vmem>>, vector<1x128xf32>
    %41 = vector.broadcast %40 : vector<1x128xf32> to vector<16x128xf32>
    %42 = arith.mulf %39, %41 : vector<16x128xf32>
    %c0_12 = arith.constant 0 : index
    %c0_13 = arith.constant 0 : index
    %43 = vector.load %arg5[%c0_12, %c0_13] : memref<1x128xf32, #tpu.memory_space<vmem>>, vector<1x128xf32>
    %44 = vector.broadcast %43 : vector<1x128xf32> to vector<16x128xf32>
    %45 = arith.addf %42, %44 : vector<16x128xf32>
    %c0_14 = arith.constant 0 : index
    %c0_15 = arith.constant 0 : index
    %46 = vector.load %arg2[%c0_14, %c0_15] : memref<16x128xf32, #tpu.memory_space<vmem>>, vector<16x128xf32>
    %47 = arith.mulf %45, %46 : vector<16x128xf32>
    %48 = arith.truncf %47 : vector<16x128xf32> to vector<16x128xbf16>
    %c0_16 = arith.constant 0 : index
    %c0_17 = arith.constant 0 : index
    %49 = vector.load %arg6[%c0_16, %c0_17] : memref<128x128xbf16, #tpu.memory_space<vmem>>, vector<128x128xbf16>
    %cst_18 = arith.constant dense<0.000000e+00> : vector<16x128xf32>
    %50 = tpu.matmul %48, %49, %cst_18 {dimension_numbers = #tpu.dot_dimension_numbers<[1], [0], [0], [1], [0, 0, 1, 1], [], []>} : vector<16x128xbf16>, vector<128x128xbf16>, vector<16x128xf32> -> vector<16x128xf32>
    %c0_19 = arith.constant 0 : index
    %c0_20 = arith.constant 0 : index
    %51 = vector.load %arg3[%c0_19, %c0_20] : memref<16x128xf32, #tpu.memory_space<vmem>>, vector<16x128xf32>
    %52 = arith.addf %51, %50 : vector<16x128xf32>
    %cst_21 = arith.constant dense<0.000000e+00> : vector<16xf32>
    %53 = vector.multi_reduction <add>, %52, %cst_21 [1] : vector<16x128xf32> to vector<16xf32>
    %54 = vector.shape_cast %53 : vector<16xf32> to vector<16x1xf32>
    %cst_22 = arith.constant 1.280000e+02 : f32
    %55 = vector.broadcast %cst_22 : f32 to vector<16x1xf32>
    %56 = arith.divf %54, %55 : vector<16x1xf32>
    %57 = vector.broadcast %56 : vector<16x1xf32> to vector<16x128xf32>
    %58 = arith.subf %52, %57 : vector<16x128xf32>
    %59 = arith.mulf %58, %58 : vector<16x128xf32>
    %cst_23 = arith.constant dense<0.000000e+00> : vector<16xf32>
    %60 = vector.multi_reduction <add>, %59, %cst_23 [1] : vector<16x128xf32> to vector<16xf32>
    %61 = vector.shape_cast %60 : vector<16xf32> to vector<16x1xf32>
    %cst_24 = arith.constant 1.280000e+02 : f32
    %62 = vector.broadcast %cst_24 : f32 to vector<16x1xf32>
    %63 = arith.divf %61, %62 : vector<16x1xf32>
    %64 = vector.broadcast %56 : vector<16x1xf32> to vector<16x128xf32>
    %65 = arith.subf %52, %64 : vector<16x128xf32>
    %cst_25 = arith.constant 9.99999974E-6 : f32
    %66 = vector.broadcast %cst_25 : f32 to vector<16x1xf32>
    %67 = arith.addf %63, %66 : vector<16x1xf32>
    %68 = math.rsqrt %67 : vector<16x1xf32>
    %69 = vector.broadcast %68 : vector<16x1xf32> to vector<16x128xf32>
    %70 = arith.mulf %65, %69 : vector<16x128xf32>
    %c0_26 = arith.constant 0 : index
    %c0_27 = arith.constant 0 : index
    %71 = vector.load %arg7[%c0_26, %c0_27] : memref<1x128xf32, #tpu.memory_space<vmem>>, vector<1x128xf32>
    %72 = vector.broadcast %71 : vector<1x128xf32> to vector<16x128xf32>
    %73 = arith.mulf %70, %72 : vector<16x128xf32>
    %c0_28 = arith.constant 0 : index
    %c0_29 = arith.constant 0 : index
    %74 = vector.load %arg8[%c0_28, %c0_29] : memref<1x128xf32, #tpu.memory_space<vmem>>, vector<1x128xf32>
    %75 = vector.broadcast %74 : vector<1x128xf32> to vector<16x128xf32>
    %76 = arith.addf %73, %75 : vector<16x128xf32>
    %77 = arith.truncf %76 : vector<16x128xf32> to vector<16x128xbf16>
    %c0_30 = arith.constant 0 : index
    %c0_31 = arith.constant 0 : index
    %78 = vector.load %arg9[%c0_30, %c0_31] : memref<128x512xbf16, #tpu.memory_space<vmem>>, vector<128x512xbf16>
    %cst_32 = arith.constant dense<0.000000e+00> : vector<16x512xf32>
    %79 = tpu.matmul %77, %78, %cst_32 {dimension_numbers = #tpu.dot_dimension_numbers<[1], [0], [0], [1], [0, 0, 1, 1], [], []>} : vector<16x128xbf16>, vector<128x512xbf16>, vector<16x512xf32> -> vector<16x512xf32>
    %cst_33 = arith.constant 0.000000e+00 : f32
    %80 = vector.broadcast %cst_33 : f32 to vector<16x512xf32>
    %81 = arith.maximumf %79, %80 : vector<16x512xf32>
    %82 = arith.mulf %81, %81 : vector<16x512xf32>
    %83 = arith.truncf %82 : vector<16x512xf32> to vector<16x512xbf16>
    %c0_34 = arith.constant 0 : index
    %c0_35 = arith.constant 0 : index
    %84 = vector.load %arg10[%c0_34, %c0_35] : memref<512x128xbf16, #tpu.memory_space<vmem>>, vector<512x128xbf16>
    %cst_36 = arith.constant dense<0.000000e+00> : vector<16x128xf32>
    %85 = tpu.matmul %83, %84, %cst_36 {dimension_numbers = #tpu.dot_dimension_numbers<[1], [0], [0], [1], [0, 0, 1, 1], [], []>} : vector<16x512xbf16>, vector<512x128xbf16>, vector<16x128xf32> -> vector<16x128xf32>
    %86 = arith.addf %52, %85 : vector<16x128xf32>
    %c0_37 = arith.constant 0 : index
    %c0_38 = arith.constant 0 : index
    %87 = vector.load %arg11[%c0_37, %c0_38] : memref<16x128xf32, #tpu.memory_space<vmem>>, vector<16x128xf32>
    tpu.vector_store %arg11[%c0_37, %c0_38], %86 {strides = array<i32>} : memref<16x128xf32, #tpu.memory_space<vmem>>, vector<16x128xf32>,
    return
  }
  func.func @transform_0(%arg0: i32) -> (i32, i32) {
    %c0_i32 = arith.constant 0 : i32
    %c0_i32_0 = arith.constant 0 : i32
    return %arg0, %c0_i32 : i32, i32
  }
  func.func @transform_1(%arg0: i32) -> (i32, i32) {
    %c0_i32 = arith.constant 0 : i32
    %c0_i32_0 = arith.constant 0 : i32
    return %arg0, %c0_i32 : i32, i32
  }
  func.func @transform_2(%arg0: i32) -> (i32, i32) {
    %c0_i32 = arith.constant 0 : i32
    %c0_i32_0 = arith.constant 0 : i32
    return %arg0, %c0_i32 : i32, i32
  }
  func.func @transform_3(%arg0: i32) -> (i32, i32) {
    %c0_i32 = arith.constant 0 : i32
    %c0_i32_0 = arith.constant 0 : i32
    %c0_i32_1 = arith.constant 0 : i32
    return %c0_i32, %c0_i32_0 : i32, i32
  }
  func.func @transform_4(%arg0: i32) -> (i32, i32) {
    %c0_i32 = arith.constant 0 : i32
    %c0_i32_0 = arith.constant 0 : i32
    %c0_i32_1 = arith.constant 0 : i32
    return %c0_i32, %c0_i32_0 : i32, i32
  }
  func.func @transform_5(%arg0: i32) -> (i32, i32) {
    %c0_i32 = arith.constant 0 : i32
    %c0_i32_0 = arith.constant 0 : i32
    %c0_i32_1 = arith.constant 0 : i32
    return %c0_i32, %c0_i32_0 : i32, i32
  }
  func.func @transform_6(%arg0: i32) -> (i32, i32) {
    %c0_i32 = arith.constant 0 : i32
    %c0_i32_0 = arith.constant 0 : i32
    %c0_i32_1 = arith.constant 0 : i32
    return %c0_i32, %c0_i32_0 : i32, i32
  }
  func.func @transform_7(%arg0: i32) -> (i32, i32) {
    %c0_i32 = arith.constant 0 : i32
    %c0_i32_0 = arith.constant 0 : i32
    %c0_i32_1 = arith.constant 0 : i32
    return %c0_i32, %c0_i32_0 : i32, i32
  }
  func.func @transform_8(%arg0: i32) -> (i32, i32) {
    %c0_i32 = arith.constant 0 : i32
    %c0_i32_0 = arith.constant 0 : i32
    %c0_i32_1 = arith.constant 0 : i32
    return %c0_i32, %c0_i32_0 : i32, i32
  }
  func.func @transform_9(%arg0: i32) -> (i32, i32) {
    %c0_i32 = arith.constant 0 : i32
    %c0_i32_0 = arith.constant 0 : i32
    %c0_i32_1 = arith.constant 0 : i32
    return %c0_i32, %c0_i32_0 : i32, i32
  }
  func.func @transform_10(%arg0: i32) -> (i32, i32) {
    %c0_i32 = arith.constant 0 : i32
    %c0_i32_0 = arith.constant 0 : i32
    return %arg0, %c0_i32 : i32, i32
  }
}

module attributes {stable_mosaic.version = 11 : i64} {
  func.func @_k2_fused_kernel(%arg0: i32, %arg1: memref<5x16x32xf32, #tpu.memory_space<vmem>>, %arg2: memref<16x128xf32, #tpu.memory_space<vmem>>, %arg3: memref<16x128xf32, #tpu.memory_space<vmem>>, %arg4: memref<5x32x128xbf16, #tpu.memory_space<vmem>>, %arg5: memref<5x1x128xf32, #tpu.memory_space<vmem>>, %arg6: memref<1x128xf32, #tpu.memory_space<vmem>>, %arg7: memref<128x64xbf16, #tpu.memory_space<vmem>>, %arg8: memref<64x128xbf16, #tpu.memory_space<vmem>>, %arg9: memref<128x128xbf16, #tpu.memory_space<vmem>>, %arg10: memref<128x128xbf16, #tpu.memory_space<vmem>>, %arg11: memref<128x160xbf16, #tpu.memory_space<vmem>>, %arg12: memref<160x128xbf16, #tpu.memory_space<vmem>>, %arg13: memref<16x128xf32, #tpu.memory_space<vmem>>, %arg14: memref<16x128xf32, #tpu.memory_space<vmem>>, %arg15: memref<16x128xf32, #tpu.memory_space<vmem>>, %arg16: memref<16x128xf32, #tpu.memory_space<vmem>>) attributes {dimension_semantics = [#tpu.dimension_semantics<parallel>], iteration_bounds = array<i64: 1>, scalar_prefetch = 0 : i64, scratch_operands = 0 : i64, tpu.core_type = #tpu.core_type<tc>, window_params = [{transform_indices = @transform_0, window_bounds = array<i64: 5, 16, 32>}, {transform_indices = @transform_1, window_bounds = array<i64: 16, 128>}, {transform_indices = @transform_2, window_bounds = array<i64: 16, 128>}, {pipeline_mode = #tpu.pipeline_mode<synchronous>, transform_indices = @transform_3, window_bounds = array<i64: 5, 32, 128>}, {pipeline_mode = #tpu.pipeline_mode<synchronous>, transform_indices = @transform_4, window_bounds = array<i64: 5, 1, 128>}, {pipeline_mode = #tpu.pipeline_mode<synchronous>, transform_indices = @transform_5, window_bounds = array<i64: 1, 128>}, {pipeline_mode = #tpu.pipeline_mode<synchronous>, transform_indices = @transform_6, window_bounds = array<i64: 128, 64>}, {pipeline_mode = #tpu.pipeline_mode<synchronous>, transform_indices = @transform_7, window_bounds = array<i64: 64, 128>}, {pipeline_mode = #tpu.pipeline_mode<synchronous>, transform_indices = @transform_8, window_bounds = array<i64: 128, 128>}, {pipeline_mode = #tpu.pipeline_mode<synchronous>, transform_indices = @transform_9, window_bounds = array<i64: 128, 128>}, {pipeline_mode = #tpu.pipeline_mode<synchronous>, transform_indices = @transform_10, window_bounds = array<i64: 128, 160>}, {pipeline_mode = #tpu.pipeline_mode<synchronous>, transform_indices = @transform_11, window_bounds = array<i64: 160, 128>}, {transform_indices = @transform_12, window_bounds = array<i64: 16, 128>}, {transform_indices = @transform_13, window_bounds = array<i64: 16, 128>}, {transform_indices = @transform_14, window_bounds = array<i64: 16, 128>}, {transform_indices = @transform_15, window_bounds = array<i64: 16, 128>}]} {
    %c0 = arith.constant 0 : index
    %c0_0 = arith.constant 0 : index
    %0 = vector.load %arg2[%c0, %c0_0] : memref<16x128xf32, #tpu.memory_space<vmem>>, vector<16x128xf32>
    %c0_1 = arith.constant 0 : index
    %c0_2 = arith.constant 0 : index
    %1 = vector.load %arg3[%c0_1, %c0_2] : memref<16x128xf32, #tpu.memory_space<vmem>>, vector<16x128xf32>
    %c0_3 = arith.constant 0 : index
    %c0_4 = arith.constant 0 : index
    %c0_5 = arith.constant 0 : index
    %2 = vector.load %arg1[%c0_3, %c0_4, %c0_5] : memref<5x16x32xf32, #tpu.memory_space<vmem>>, vector<1x16x32xf32>
    %3 = vector.shape_cast %2 : vector<1x16x32xf32> to vector<16x32xf32>
    %4 = arith.truncf %3 : vector<16x32xf32> to vector<16x32xbf16>
    %c0_6 = arith.constant 0 : index
    %c0_7 = arith.constant 0 : index
    %c0_8 = arith.constant 0 : index
    %5 = vector.load %arg4[%c0_6, %c0_7, %c0_8] : memref<5x32x128xbf16, #tpu.memory_space<vmem>>, vector<1x32x128xbf16>
    %6 = vector.shape_cast %5 : vector<1x32x128xbf16> to vector<32x128xbf16>
    %cst = arith.constant dense<0.000000e+00> : vector<16x128xf32>
    %7 = tpu.matmul %4, %6, %cst {dimension_numbers = #tpu.dot_dimension_numbers<[1], [0], [0], [1], [0, 0, 1, 1], [], []>} : vector<16x32xbf16>, vector<32x128xbf16>, vector<16x128xf32> -> vector<16x128xf32>
    %c0_9 = arith.constant 0 : index
    %c0_10 = arith.constant 0 : index
    %c0_11 = arith.constant 0 : index
    %8 = vector.load %arg5[%c0_9, %c0_10, %c0_11] : memref<5x1x128xf32, #tpu.memory_space<vmem>>, vector<1x1x128xf32>
    %9 = vector.shape_cast %8 : vector<1x1x128xf32> to vector<1x128xf32>
    %10 = vector.broadcast %9 : vector<1x128xf32> to vector<16x128xf32>
    %11 = arith.addf %7, %10 : vector<16x128xf32>
    %12 = arith.mulf %1, %11 : vector<16x128xf32>
    %13 = arith.addf %0, %12 : vector<16x128xf32>
    %c2 = arith.constant 2 : index
    %c0_12 = arith.constant 0 : index
    %c0_13 = arith.constant 0 : index
    %14 = vector.load %arg1[%c2, %c0_12, %c0_13] : memref<5x16x32xf32, #tpu.memory_space<vmem>>, vector<1x16x32xf32>
    %15 = vector.shape_cast %14 : vector<1x16x32xf32> to vector<16x32xf32>
    %16 = arith.truncf %15 : vector<16x32xf32> to vector<16x32xbf16>
    %c2_14 = arith.constant 2 : index
    %c0_15 = arith.constant 0 : index
    %c0_16 = arith.constant 0 : index
    %17 = vector.load %arg4[%c2_14, %c0_15, %c0_16] : memref<5x32x128xbf16, #tpu.memory_space<vmem>>, vector<1x32x128xbf16>
    %18 = vector.shape_cast %17 : vector<1x32x128xbf16> to vector<32x128xbf16>
    %cst_17 = arith.constant dense<0.000000e+00> : vector<16x128xf32>
    %19 = tpu.matmul %16, %18, %cst_17 {dimension_numbers = #tpu.dot_dimension_numbers<[1], [0], [0], [1], [0, 0, 1, 1], [], []>} : vector<16x32xbf16>, vector<32x128xbf16>, vector<16x128xf32> -> vector<16x128xf32>
    %c2_18 = arith.constant 2 : index
    %c0_19 = arith.constant 0 : index
    %c0_20 = arith.constant 0 : index
    %20 = vector.load %arg5[%c2_18, %c0_19, %c0_20] : memref<5x1x128xf32, #tpu.memory_space<vmem>>, vector<1x1x128xf32>
    %21 = vector.shape_cast %20 : vector<1x1x128xf32> to vector<1x128xf32>
    %22 = vector.broadcast %21 : vector<1x128xf32> to vector<16x128xf32>
    %23 = arith.addf %19, %22 : vector<16x128xf32>
    %24 = arith.mulf %1, %23 : vector<16x128xf32>
    %25 = arith.addf %0, %24 : vector<16x128xf32>
    %c3 = arith.constant 3 : index
    %c0_21 = arith.constant 0 : index
    %c0_22 = arith.constant 0 : index
    %26 = vector.load %arg1[%c3, %c0_21, %c0_22] : memref<5x16x32xf32, #tpu.memory_space<vmem>>, vector<1x16x32xf32>
    %27 = vector.shape_cast %26 : vector<1x16x32xf32> to vector<16x32xf32>
    %28 = arith.truncf %27 : vector<16x32xf32> to vector<16x32xbf16>
    %c3_23 = arith.constant 3 : index
    %c0_24 = arith.constant 0 : index
    %c0_25 = arith.constant 0 : index
    %29 = vector.load %arg4[%c3_23, %c0_24, %c0_25] : memref<5x32x128xbf16, #tpu.memory_space<vmem>>, vector<1x32x128xbf16>
    %30 = vector.shape_cast %29 : vector<1x32x128xbf16> to vector<32x128xbf16>
    %cst_26 = arith.constant dense<0.000000e+00> : vector<16x128xf32>
    %31 = tpu.matmul %28, %30, %cst_26 {dimension_numbers = #tpu.dot_dimension_numbers<[1], [0], [0], [1], [0, 0, 1, 1], [], []>} : vector<16x32xbf16>, vector<32x128xbf16>, vector<16x128xf32> -> vector<16x128xf32>
    %c3_27 = arith.constant 3 : index
    %c0_28 = arith.constant 0 : index
    %c0_29 = arith.constant 0 : index
    %32 = vector.load %arg5[%c3_27, %c0_28, %c0_29] : memref<5x1x128xf32, #tpu.memory_space<vmem>>, vector<1x1x128xf32>
    %33 = vector.shape_cast %32 : vector<1x1x128xf32> to vector<1x128xf32>
    %34 = vector.broadcast %33 : vector<1x128xf32> to vector<16x128xf32>
    %35 = arith.addf %31, %34 : vector<16x128xf32>
    %36 = arith.mulf %1, %35 : vector<16x128xf32>
    %37 = arith.addf %0, %36 : vector<16x128xf32>
    %c4 = arith.constant 4 : index
    %c0_30 = arith.constant 0 : index
    %c0_31 = arith.constant 0 : index
    %38 = vector.load %arg1[%c4, %c0_30, %c0_31] : memref<5x16x32xf32, #tpu.memory_space<vmem>>, vector<1x16x32xf32>
    %39 = vector.shape_cast %38 : vector<1x16x32xf32> to vector<16x32xf32>
    %40 = arith.truncf %39 : vector<16x32xf32> to vector<16x32xbf16>
    %c4_32 = arith.constant 4 : index
    %c0_33 = arith.constant 0 : index
    %c0_34 = arith.constant 0 : index
    %41 = vector.load %arg4[%c4_32, %c0_33, %c0_34] : memref<5x32x128xbf16, #tpu.memory_space<vmem>>, vector<1x32x128xbf16>
    %42 = vector.shape_cast %41 : vector<1x32x128xbf16> to vector<32x128xbf16>
    %cst_35 = arith.constant dense<0.000000e+00> : vector<16x128xf32>
    %43 = tpu.matmul %40, %42, %cst_35 {dimension_numbers = #tpu.dot_dimension_numbers<[1], [0], [0], [1], [0, 0, 1, 1], [], []>} : vector<16x32xbf16>, vector<32x128xbf16>, vector<16x128xf32> -> vector<16x128xf32>
    %c4_36 = arith.constant 4 : index
    %c0_37 = arith.constant 0 : index
    %c0_38 = arith.constant 0 : index
    %44 = vector.load %arg5[%c4_36, %c0_37, %c0_38] : memref<5x1x128xf32, #tpu.memory_space<vmem>>, vector<1x1x128xf32>
    %45 = vector.shape_cast %44 : vector<1x1x128xf32> to vector<1x128xf32>
    %46 = vector.broadcast %45 : vector<1x128xf32> to vector<16x128xf32>
    %47 = arith.addf %43, %46 : vector<16x128xf32>
    %48 = arith.mulf %1, %47 : vector<16x128xf32>
    %49 = arith.addf %0, %48 : vector<16x128xf32>
    %c0_39 = arith.constant 0 : index
    %c0_40 = arith.constant 0 : index
    %50 = vector.load %arg6[%c0_39, %c0_40] : memref<1x128xf32, #tpu.memory_space<vmem>>, vector<1x128xf32>
    %51 = arith.truncf %13 : vector<16x128xf32> to vector<16x128xbf16>
    %c0_41 = arith.constant 0 : index
    %c0_42 = arith.constant 0 : index
    %52 = vector.load %arg7[%c0_41, %c0_42] : memref<128x64xbf16, #tpu.memory_space<vmem>>, vector<128x64xbf16>
    %cst_43 = arith.constant dense<0.000000e+00> : vector<16x64xf32>
    %53 = tpu.matmul %51, %52, %cst_43 {dimension_numbers = #tpu.dot_dimension_numbers<[1], [0], [0], [1], [0, 0, 1, 1], [], []>} : vector<16x128xbf16>, vector<128x64xbf16>, vector<16x64xf32> -> vector<16x64xf32>
    %54 = math.tanh %53 : vector<16x64xf32>
    %55 = arith.truncf %54 : vector<16x64xf32> to vector<16x64xbf16>
    %c0_44 = arith.constant 0 : index
    %c0_45 = arith.constant 0 : index
    %56 = vector.load %arg8[%c0_44, %c0_45] : memref<64x128xbf16, #tpu.memory_space<vmem>>, vector<64x128xbf16>
    %cst_46 = arith.constant dense<0.000000e+00> : vector<16x128xf32>
    %57 = tpu.matmul %55, %56, %cst_46 {dimension_numbers = #tpu.dot_dimension_numbers<[1], [0], [0], [1], [0, 0, 1, 1], [], []>} : vector<16x64xbf16>, vector<64x128xbf16>, vector<16x128xf32> -> vector<16x128xf32>
    %58 = vector.broadcast %50 : vector<1x128xf32> to vector<16x128xf32>
    %59 = arith.addf %58, %57 : vector<16x128xf32>
    %c0_47 = arith.constant 0 : index
    %c0_48 = arith.constant 0 : index
    %60 = vector.load %arg15[%c0_47, %c0_48] : memref<16x128xf32, #tpu.memory_space<vmem>>, vector<16x128xf32>
    tpu.vector_store %arg15[%c0_47, %c0_48], %59 {strides = array<i32>} : memref<16x128xf32, #tpu.memory_space<vmem>>, vector<16x128xf32>,
    %61 = arith.truncf %25 : vector<16x128xf32> to vector<16x128xbf16>
    %c0_49 = arith.constant 0 : index
    %c0_50 = arith.constant 0 : index
    %62 = vector.load %arg9[%c0_49, %c0_50] : memref<128x128xbf16, #tpu.memory_space<vmem>>, vector<128x128xbf16>
    %cst_51 = arith.constant dense<0.000000e+00> : vector<16x128xf32>
    %63 = tpu.matmul %61, %62, %cst_51 {dimension_numbers = #tpu.dot_dimension_numbers<[1], [0], [0], [1], [0, 0, 1, 1], [], []>} : vector<16x128xbf16>, vector<128x128xbf16>, vector<16x128xf32> -> vector<16x128xf32>
    %c0_52 = arith.constant 0 : index
    %c0_53 = arith.constant 0 : index
    %64 = vector.load %arg14[%c0_52, %c0_53] : memref<16x128xf32, #tpu.memory_space<vmem>>, vector<16x128xf32>
    tpu.vector_store %arg14[%c0_52, %c0_53], %63 {strides = array<i32>} : memref<16x128xf32, #tpu.memory_space<vmem>>, vector<16x128xf32>,
    %65 = arith.truncf %37 : vector<16x128xf32> to vector<16x128xbf16>
    %c0_54 = arith.constant 0 : index
    %c0_55 = arith.constant 0 : index
    %66 = vector.load %arg10[%c0_54, %c0_55] : memref<128x128xbf16, #tpu.memory_space<vmem>>, vector<128x128xbf16>
    %cst_56 = arith.constant dense<0.000000e+00> : vector<16x128xf32>
    %67 = tpu.matmul %65, %66, %cst_56 {dimension_numbers = #tpu.dot_dimension_numbers<[1], [0], [0], [1], [0, 0, 1, 1], [], []>} : vector<16x128xbf16>, vector<128x128xbf16>, vector<16x128xf32> -> vector<16x128xf32>
    %c0_57 = arith.constant 0 : index
    %c0_58 = arith.constant 0 : index
    %68 = vector.load %arg13[%c0_57, %c0_58] : memref<16x128xf32, #tpu.memory_space<vmem>>, vector<16x128xf32>
    tpu.vector_store %arg13[%c0_57, %c0_58], %67 {strides = array<i32>} : memref<16x128xf32, #tpu.memory_space<vmem>>, vector<16x128xf32>,
    %69 = arith.truncf %49 : vector<16x128xf32> to vector<16x128xbf16>
    %c0_59 = arith.constant 0 : index
    %c0_60 = arith.constant 0 : index
    %70 = vector.load %arg11[%c0_59, %c0_60] : memref<128x160xbf16, #tpu.memory_space<vmem>>, vector<128x160xbf16>
    %cst_61 = arith.constant dense<0.000000e+00> : vector<16x160xf32>
    %71 = tpu.matmul %69, %70, %cst_61 {dimension_numbers = #tpu.dot_dimension_numbers<[1], [0], [0], [1], [0, 0, 1, 1], [], []>} : vector<16x128xbf16>, vector<128x160xbf16>, vector<16x160xf32> -> vector<16x160xf32>
    %72 = math.tanh %71 : vector<16x160xf32>
    %73 = arith.truncf %72 : vector<16x160xf32> to vector<16x160xbf16>
    %c0_62 = arith.constant 0 : index
    %c0_63 = arith.constant 0 : index
    %74 = vector.load %arg12[%c0_62, %c0_63] : memref<160x128xbf16, #tpu.memory_space<vmem>>, vector<160x128xbf16>
    %cst_64 = arith.constant dense<0.000000e+00> : vector<16x128xf32>
    %75 = tpu.matmul %73, %74, %cst_64 {dimension_numbers = #tpu.dot_dimension_numbers<[1], [0], [0], [1], [0, 0, 1, 1], [], []>} : vector<16x160xbf16>, vector<160x128xbf16>, vector<16x128xf32> -> vector<16x128xf32>
    %c0_65 = arith.constant 0 : index
    %c0_66 = arith.constant 0 : index
    %76 = vector.load %arg16[%c0_65, %c0_66] : memref<16x128xf32, #tpu.memory_space<vmem>>, vector<16x128xf32>
    tpu.vector_store %arg16[%c0_65, %c0_66], %75 {strides = array<i32>} : memref<16x128xf32, #tpu.memory_space<vmem>>, vector<16x128xf32>,
    return
  }
  func.func @transform_0(%arg0: i32) -> (i32, i32, i32) {
    %c0_i32 = arith.constant 0 : i32
    %c0_i32_0 = arith.constant 0 : i32
    %c0_i32_1 = arith.constant 0 : i32
    return %c0_i32, %arg0, %c0_i32_0 : i32, i32, i32
  }
  func.func @transform_1(%arg0: i32) -> (i32, i32) {
    %c0_i32 = arith.constant 0 : i32
    %c0_i32_0 = arith.constant 0 : i32
    return %arg0, %c0_i32 : i32, i32
  }
  func.func @transform_2(%arg0: i32) -> (i32, i32) {
    %c0_i32 = arith.constant 0 : i32
    %c0_i32_0 = arith.constant 0 : i32
    return %arg0, %c0_i32 : i32, i32
  }
  func.func @transform_3(%arg0: i32) -> (i32, i32, i32) {
    %c0_i32 = arith.constant 0 : i32
    %c0_i32_0 = arith.constant 0 : i32
    %c0_i32_1 = arith.constant 0 : i32
    %c0_i32_2 = arith.constant 0 : i32
    return %c0_i32, %c0_i32_0, %c0_i32_1 : i32, i32, i32
  }
  func.func @transform_4(%arg0: i32) -> (i32, i32, i32) {
    %c0_i32 = arith.constant 0 : i32
    %c0_i32_0 = arith.constant 0 : i32
    %c0_i32_1 = arith.constant 0 : i32
    %c0_i32_2 = arith.constant 0 : i32
    return %c0_i32, %c0_i32_0, %c0_i32_1 : i32, i32, i32
  }
  func.func @transform_5(%arg0: i32) -> (i32, i32) {
    %c0_i32 = arith.constant 0 : i32
    %c0_i32_0 = arith.constant 0 : i32
    %c0_i32_1 = arith.constant 0 : i32
    return %c0_i32, %c0_i32_0 : i32, i32
  }
  func.func @transform_6(%arg0: i32) -> (i32, i32) {
    %c0_i32 = arith.constant 0 : i32
    %c0_i32_0 = arith.constant 0 : i32
    %c0_i32_1 = arith.constant 0 : i32
    return %c0_i32, %c0_i32_0 : i32, i32
  }
  func.func @transform_7(%arg0: i32) -> (i32, i32) {
    %c0_i32 = arith.constant 0 : i32
    %c0_i32_0 = arith.constant 0 : i32
    %c0_i32_1 = arith.constant 0 : i32
    return %c0_i32, %c0_i32_0 : i32, i32
  }
  func.func @transform_8(%arg0: i32) -> (i32, i32) {
    %c0_i32 = arith.constant 0 : i32
    %c0_i32_0 = arith.constant 0 : i32
    %c0_i32_1 = arith.constant 0 : i32
    return %c0_i32, %c0_i32_0 : i32, i32
  }
  func.func @transform_9(%arg0: i32) -> (i32, i32) {
    %c0_i32 = arith.constant 0 : i32
    %c0_i32_0 = arith.constant 0 : i32
    %c0_i32_1 = arith.constant 0 : i32
    return %c0_i32, %c0_i32_0 : i32, i32
  }
  func.func @transform_10(%arg0: i32) -> (i32, i32) {
    %c0_i32 = arith.constant 0 : i32
    %c0_i32_0 = arith.constant 0 : i32
    %c0_i32_1 = arith.constant 0 : i32
    return %c0_i32, %c0_i32_0 : i32, i32
  }
  func.func @transform_11(%arg0: i32) -> (i32, i32) {
    %c0_i32 = arith.constant 0 : i32
    %c0_i32_0 = arith.constant 0 : i32
    %c0_i32_1 = arith.constant 0 : i32
    return %c0_i32, %c0_i32_0 : i32, i32
  }
  func.func @transform_12(%arg0: i32) -> (i32, i32) {
    %c0_i32 = arith.constant 0 : i32
    %c0_i32_0 = arith.constant 0 : i32
    return %arg0, %c0_i32 : i32, i32
  }
  func.func @transform_13(%arg0: i32) -> (i32, i32) {
    %c0_i32 = arith.constant 0 : i32
    %c0_i32_0 = arith.constant 0 : i32
    return %arg0, %c0_i32 : i32, i32
  }
  func.func @transform_14(%arg0: i32) -> (i32, i32) {
    %c0_i32 = arith.constant 0 : i32
    %c0_i32_0 = arith.constant 0 : i32
    return %arg0, %c0_i32 : i32, i32
  }
  func.func @transform_15(%arg0: i32) -> (i32, i32) {
    %c0_i32 = arith.constant 0 : i32
    %c0_i32_0 = arith.constant 0 : i32
    return %arg0, %c0_i32 : i32, i32
  }
}

module attributes {stable_mosaic.version = 11 : i64} {
  func.func @_wkv_kernel(%arg0: i32, %arg1: i32, %arg2: memref<1x8x128xf32, #tpu.memory_space<vmem>>, %arg3: memref<1x8x128xf32, #tpu.memory_space<vmem>>, %arg4: memref<1x8x128xf32, #tpu.memory_space<vmem>>, %arg5: memref<2x64xf32, #tpu.memory_space<vmem>>, %arg6: memref<1x8x128xf32, #tpu.memory_space<vmem>>, %arg7: memref<2x64x64xf32, #tpu.memory_space<vmem>>) attributes {dimension_semantics = [#tpu.dimension_semantics<parallel>, #tpu.dimension_semantics<arbitrary>], iteration_bounds = array<i64: 2, 1>, scalar_prefetch = 0 : i64, scratch_operands = 1 : i64, tpu.core_type = #tpu.core_type<tc>, window_params = [{transform_indices = @transform_0, window_bounds = array<i64: 1, 8, 128>}, {transform_indices = @transform_1, window_bounds = array<i64: 1, 8, 128>}, {transform_indices = @transform_2, window_bounds = array<i64: 1, 8, 128>}, {pipeline_mode = #tpu.pipeline_mode<synchronous>, transform_indices = @transform_3, window_bounds = array<i64: 2, 64>}, {transform_indices = @transform_4, window_bounds = array<i64: 1, 8, 128>}]} {
    %c0_i32 = arith.constant 0 : i32
    %0 = arith.cmpi eq, %arg1, %c0_i32 : i32
    %1 = arith.extui %0 : i1 to i32
    %c0_i32_0 = arith.constant 0 : i32
    %2 = arith.cmpi ne, %1, %c0_i32_0 : i32
    scf.if %2 {
      %cst_42 = arith.constant 0.000000e+00 : f32
      %108 = vector.broadcast %cst_42 : f32 to vector<2x64x64xf32>
      %c0_43 = arith.constant 0 : index
      %c0_44 = arith.constant 0 : index
      %c0_45 = arith.constant 0 : index
      %109 = vector.load %arg7[%c0_43, %c0_44, %c0_45] : memref<2x64x64xf32, #tpu.memory_space<vmem>>, vector<2x64x64xf32>
      tpu.vector_store %arg7[%c0_43, %c0_44, %c0_45], %108 {strides = array<i32>} : memref<2x64x64xf32, #tpu.memory_space<vmem>>, vector<2x64x64xf32>,
    } else {
    }
    %c0 = arith.constant 0 : index
    %c0_1 = arith.constant 0 : index
    %c0_2 = arith.constant 0 : index
    %3 = vector.load %arg2[%c0, %c0_1, %c0_2] : memref<1x8x128xf32, #tpu.memory_space<vmem>>, vector<1x8x128xf32>
    %4 = vector.shape_cast %3 : vector<1x8x128xf32> to vector<8x128xf32>
    %c0_3 = arith.constant 0 : index
    %c0_4 = arith.constant 0 : index
    %c0_5 = arith.constant 0 : index
    %5 = vector.load %arg3[%c0_3, %c0_4, %c0_5] : memref<1x8x128xf32, #tpu.memory_space<vmem>>, vector<1x8x128xf32>
    %6 = vector.shape_cast %5 : vector<1x8x128xf32> to vector<8x128xf32>
    %c0_6 = arith.constant 0 : index
    %c0_7 = arith.constant 0 : index
    %c0_8 = arith.constant 0 : index
    %7 = vector.load %arg4[%c0_6, %c0_7, %c0_8] : memref<1x8x128xf32, #tpu.memory_space<vmem>>, vector<1x8x128xf32>
    %8 = vector.shape_cast %7 : vector<1x8x128xf32> to vector<8x128xf32>
    %c0_9 = arith.constant 0 : index
    %c0_10 = arith.constant 0 : index
    %9 = vector.load %arg5[%c0_9, %c0_10] : memref<2x64xf32, #tpu.memory_space<vmem>>, vector<2x64xf32>
    %10 = tpu.iota {dimensions = array<i32: 0>} : vector<8x8xi32>
    %11 = tpu.iota {dimensions = array<i32: 1>} : vector<8x8xi32>
    %12 = arith.cmpi sle, %11, %10 : vector<8x8xi32>
    %13 = arith.extui %12 : vector<8x8xi1> to vector<8x8xi32>
    %14 = arith.sitofp %13 : vector<8x8xi32> to vector<8x8xf32>
    %15 = arith.cmpi sgt, %10, %11 : vector<8x8xi32>
    %16 = vector.extract_strided_slice %4 {offsets = [0, 0], sizes = [8, 64], strides = [1, 1]} : vector<8x128xf32> to vector<8x64xf32>
    %17 = vector.extract_strided_slice %6 {offsets = [0, 0], sizes = [8, 64], strides = [1, 1]} : vector<8x128xf32> to vector<8x64xf32>
    %18 = vector.extract_strided_slice %8 {offsets = [0, 0], sizes = [8, 64], strides = [1, 1]} : vector<8x128xf32> to vector<8x64xf32>
    %19 = math.exp %18 : vector<8x64xf32>
    %cst = arith.constant 0.000000e+00 : f32
    %20 = vector.broadcast %cst : f32 to vector<8x64xf32>
    %21 = arith.subf %20, %19 : vector<8x64xf32>
    %cst_11 = arith.constant dense<0.000000e+00> : vector<8x64xf32>
    %22 = tpu.matmul %14, %21, %cst_11 {dimension_numbers = #tpu.dot_dimension_numbers<[1], [0], [0], [1], [0, 0, 1, 1], [], []>} : vector<8x8xf32>, vector<8x64xf32>, vector<8x64xf32> -> vector<8x64xf32>
    %23 = arith.subf %22, %21 : vector<8x64xf32>
    %c0_12 = arith.constant 0 : index
    %c0_13 = arith.constant 0 : index
    %c0_14 = arith.constant 0 : index
    %24 = vector.load %arg7[%c0_12, %c0_13, %c0_14] : memref<2x64x64xf32, #tpu.memory_space<vmem>>, vector<1x64x64xf32>
    %25 = vector.shape_cast %24 : vector<1x64x64xf32> to vector<64x64xf32>
    %26 = math.exp %23 : vector<8x64xf32>
    %27 = arith.mulf %16, %26 : vector<8x64xf32>
    %cst_15 = arith.constant dense<0.000000e+00> : vector<8x64xf32>
    %28 = tpu.matmul %27, %25, %cst_15 {dimension_numbers = #tpu.dot_dimension_numbers<[1], [1], [0], [0], [0, 0, 1, 0], [], []>} : vector<8x64xf32>, vector<64x64xf32>, vector<8x64xf32> -> vector<8x64xf32>
    %cst_16 = arith.constant 0.000000e+00 : f32
    %29 = vector.broadcast %cst_16 : f32 to vector<8x64xf32>
    %30 = arith.subf %29, %22 : vector<8x64xf32>
    %31 = math.exp %30 : vector<8x64xf32>
    %32 = arith.mulf %18, %31 : vector<8x64xf32>
    %cst_17 = arith.constant dense<0.000000e+00> : vector<8x8xf32>
    %33 = tpu.matmul %27, %32, %cst_17 {dimension_numbers = #tpu.dot_dimension_numbers<[1], [1], [0], [0], [0, 0, 1, 0], [], []>} : vector<8x64xf32>, vector<8x64xf32>, vector<8x8xf32> -> vector<8x8xf32>
    %cst_18 = arith.constant 0.000000e+00 : f32
    %34 = vector.broadcast %cst_18 : f32 to vector<8x8xf32>
    %35 = arith.select %15, %33, %34 : vector<8x8xi1>, vector<8x8xf32>
    %cst_19 = arith.constant dense<0.000000e+00> : vector<8x64xf32>
    %36 = tpu.matmul %35, %17, %cst_19 {dimension_numbers = #tpu.dot_dimension_numbers<[1], [0], [0], [1], [0, 0, 1, 1], [], []>} : vector<8x8xf32>, vector<8x64xf32>, vector<8x64xf32> -> vector<8x64xf32>
    %37 = vector.extract_strided_slice %9 {offsets = [0, 0], sizes = [1, 64], strides = [1, 1]} : vector<2x64xf32> to vector<1x64xf32>
    %38 = vector.broadcast %37 : vector<1x64xf32> to vector<8x64xf32>
    %39 = arith.mulf %16, %38 : vector<8x64xf32>
    %40 = arith.mulf %39, %18 : vector<8x64xf32>
    %cst_20 = arith.constant dense<0.000000e+00> : vector<8xf32>
    %41 = vector.multi_reduction <add>, %40, %cst_20 [1] : vector<8x64xf32> to vector<8xf32>
    %42 = vector.shape_cast %41 : vector<8xf32> to vector<8x1xf32>
    %43 = arith.addf %28, %36 : vector<8x64xf32>
    %44 = vector.broadcast %42 : vector<8x1xf32> to vector<8x64xf32>
    %45 = arith.mulf %44, %17 : vector<8x64xf32>
    %46 = arith.addf %43, %45 : vector<8x64xf32>
    %47 = vector.extract_strided_slice %22 {offsets = [7, 0], sizes = [1, 64], strides = [1, 1]} : vector<8x64xf32> to vector<1x64xf32>
    %48 = vector.broadcast %47 : vector<1x64xf32> to vector<8x64xf32>
    %49 = arith.subf %48, %22 : vector<8x64xf32>
    %50 = math.exp %49 : vector<8x64xf32>
    %51 = arith.mulf %18, %50 : vector<8x64xf32>
    %52 = math.exp %47 : vector<1x64xf32>
    %53 = vector.broadcast %52 : vector<1x64xf32> to vector<64x64xf32>
    %54 = arith.mulf %25, %53 : vector<64x64xf32>
    %cst_21 = arith.constant dense<0.000000e+00> : vector<64x64xf32>
    %55 = tpu.matmul %17, %51, %cst_21 {dimension_numbers = #tpu.dot_dimension_numbers<[0], [0], [1], [1], [0, 1, 1, 1], [], []>} : vector<8x64xf32>, vector<8x64xf32>, vector<64x64xf32> -> vector<64x64xf32>
    %56 = arith.addf %54, %55 : vector<64x64xf32>
    %c0_22 = arith.constant 0 : index
    %c0_23 = arith.constant 0 : index
    %c0_24 = arith.constant 0 : index
    %57 = vector.load %arg7[%c0_22, %c0_23, %c0_24] : memref<2x64x64xf32, #tpu.memory_space<vmem>>, vector<1x64x64xf32>
    %58 = vector.shape_cast %57 : vector<1x64x64xf32> to vector<64x64xf32>
    %59 = vector.shape_cast %56 : vector<64x64xf32> to vector<1x64x64xf32>
    tpu.vector_store %arg7[%c0_22, %c0_23, %c0_24], %59 {strides = array<i32>} : memref<2x64x64xf32, #tpu.memory_space<vmem>>, vector<1x64x64xf32>,
    %60 = vector.extract_strided_slice %4 {offsets = [0, 64], sizes = [8, 64], strides = [1, 1]} : vector<8x128xf32> to vector<8x64xf32>
    %61 = vector.extract_strided_slice %6 {offsets = [0, 64], sizes = [8, 64], strides = [1, 1]} : vector<8x128xf32> to vector<8x64xf32>
    %62 = vector.extract_strided_slice %8 {offsets = [0, 64], sizes = [8, 64], strides = [1, 1]} : vector<8x128xf32> to vector<8x64xf32>
    %63 = math.exp %62 : vector<8x64xf32>
    %cst_25 = arith.constant 0.000000e+00 : f32
    %64 = vector.broadcast %cst_25 : f32 to vector<8x64xf32>
    %65 = arith.subf %64, %63 : vector<8x64xf32>
    %cst_26 = arith.constant dense<0.000000e+00> : vector<8x64xf32>
    %66 = tpu.matmul %14, %65, %cst_26 {dimension_numbers = #tpu.dot_dimension_numbers<[1], [0], [0], [1], [0, 0, 1, 1], [], []>} : vector<8x8xf32>, vector<8x64xf32>, vector<8x64xf32> -> vector<8x64xf32>
    %67 = arith.subf %66, %65 : vector<8x64xf32>
    %c1 = arith.constant 1 : index
    %c0_27 = arith.constant 0 : index
    %c0_28 = arith.constant 0 : index
    %68 = vector.load %arg7[%c1, %c0_27, %c0_28] : memref<2x64x64xf32, #tpu.memory_space<vmem>>, vector<1x64x64xf32>
    %69 = vector.shape_cast %68 : vector<1x64x64xf32> to vector<64x64xf32>
    %70 = math.exp %67 : vector<8x64xf32>
    %71 = arith.mulf %60, %70 : vector<8x64xf32>
    %cst_29 = arith.constant dense<0.000000e+00> : vector<8x64xf32>
    %72 = tpu.matmul %71, %69, %cst_29 {dimension_numbers = #tpu.dot_dimension_numbers<[1], [1], [0], [0], [0, 0, 1, 0], [], []>} : vector<8x64xf32>, vector<64x64xf32>, vector<8x64xf32> -> vector<8x64xf32>
    %cst_30 = arith.constant 0.000000e+00 : f32
    %73 = vector.broadcast %cst_30 : f32 to vector<8x64xf32>
    %74 = arith.subf %73, %66 : vector<8x64xf32>
    %75 = math.exp %74 : vector<8x64xf32>
    %76 = arith.mulf %62, %75 : vector<8x64xf32>
    %cst_31 = arith.constant dense<0.000000e+00> : vector<8x8xf32>
    %77 = tpu.matmul %71, %76, %cst_31 {dimension_numbers = #tpu.dot_dimension_numbers<[1], [1], [0], [0], [0, 0, 1, 0], [], []>} : vector<8x64xf32>, vector<8x64xf32>, vector<8x8xf32> -> vector<8x8xf32>
    %cst_32 = arith.constant 0.000000e+00 : f32
    %78 = vector.broadcast %cst_32 : f32 to vector<8x8xf32>
    %79 = arith.select %15, %77, %78 : vector<8x8xi1>, vector<8x8xf32>
    %cst_33 = arith.constant dense<0.000000e+00> : vector<8x64xf32>
    %80 = tpu.matmul %79, %61, %cst_33 {dimension_numbers = #tpu.dot_dimension_numbers<[1], [0], [0], [1], [0, 0, 1, 1], [], []>} : vector<8x8xf32>, vector<8x64xf32>, vector<8x64xf32> -> vector<8x64xf32>
    %81 = vector.extract_strided_slice %9 {offsets = [1, 0], sizes = [1, 64], strides = [1, 1]} : vector<2x64xf32> to vector<1x64xf32>
    %82 = vector.broadcast %81 : vector<1x64xf32> to vector<8x64xf32>
    %83 = arith.mulf %60, %82 : vector<8x64xf32>
    %84 = arith.mulf %83, %62 : vector<8x64xf32>
    %cst_34 = arith.constant dense<0.000000e+00> : vector<8xf32>
    %85 = vector.multi_reduction <add>, %84, %cst_34 [1] : vector<8x64xf32> to vector<8xf32>
    %86 = vector.shape_cast %85 : vector<8xf32> to vector<8x1xf32>
    %87 = arith.addf %72, %80 : vector<8x64xf32>
    %88 = vector.broadcast %86 : vector<8x1xf32> to vector<8x64xf32>
    %89 = arith.mulf %88, %61 : vector<8x64xf32>
    %90 = arith.addf %87, %89 : vector<8x64xf32>
    %91 = vector.extract_strided_slice %66 {offsets = [7, 0], sizes = [1, 64], strides = [1, 1]} : vector<8x64xf32> to vector<1x64xf32>
    %92 = vector.broadcast %91 : vector<1x64xf32> to vector<8x64xf32>
    %93 = arith.subf %92, %66 : vector<8x64xf32>
    %94 = math.exp %93 : vector<8x64xf32>
    %95 = arith.mulf %62, %94 : vector<8x64xf32>
    %96 = math.exp %91 : vector<1x64xf32>
    %97 = vector.broadcast %96 : vector<1x64xf32> to vector<64x64xf32>
    %98 = arith.mulf %69, %97 : vector<64x64xf32>
    %cst_35 = arith.constant dense<0.000000e+00> : vector<64x64xf32>
    %99 = tpu.matmul %61, %95, %cst_35 {dimension_numbers = #tpu.dot_dimension_numbers<[0], [0], [1], [1], [0, 1, 1, 1], [], []>} : vector<8x64xf32>, vector<8x64xf32>, vector<64x64xf32> -> vector<64x64xf32>
    %100 = arith.addf %98, %99 : vector<64x64xf32>
    %c1_36 = arith.constant 1 : index
    %c0_37 = arith.constant 0 : index
    %c0_38 = arith.constant 0 : index
    %101 = vector.load %arg7[%c1_36, %c0_37, %c0_38] : memref<2x64x64xf32, #tpu.memory_space<vmem>>, vector<1x64x64xf32>
    %102 = vector.shape_cast %101 : vector<1x64x64xf32> to vector<64x64xf32>
    %103 = vector.shape_cast %100 : vector<64x64xf32> to vector<1x64x64xf32>
    tpu.vector_store %arg7[%c1_36, %c0_37, %c0_38], %103 {strides = array<i32>} : memref<2x64x64xf32, #tpu.memory_space<vmem>>, vector<1x64x64xf32>,
    %104 = tpu.concatenate %46, %90 in 1 : vector<8x64xf32>, vector<8x64xf32> -> vector<8x128xf32>
    %c0_39 = arith.constant 0 : index
    %c0_40 = arith.constant 0 : index
    %c0_41 = arith.constant 0 : index
    %105 = vector.load %arg6[%c0_39, %c0_40, %c0_41] : memref<1x8x128xf32, #tpu.memory_space<vmem>>, vector<1x8x128xf32>
    %106 = vector.shape_cast %105 : vector<1x8x128xf32> to vector<8x128xf32>
    %107 = vector.shape_cast %104 : vector<8x128xf32> to vector<1x8x128xf32>
    tpu.vector_store %arg6[%c0_39, %c0_40, %c0_41], %107 {strides = array<i32>} : memref<1x8x128xf32, #tpu.memory_space<vmem>>, vector<1x8x128xf32>,
    return
  }
  func.func @transform_0(%arg0: i32, %arg1: i32) -> (i32, i32, i32) {
    %c0_i32 = arith.constant 0 : i32
    %c0_i32_0 = arith.constant 0 : i32
    return %arg0, %arg1, %c0_i32 : i32, i32, i32
  }
  func.func @transform_1(%arg0: i32, %arg1: i32) -> (i32, i32, i32) {
    %c0_i32 = arith.constant 0 : i32
    %c0_i32_0 = arith.constant 0 : i32
    return %arg0, %arg1, %c0_i32 : i32, i32, i32
  }
  func.func @transform_2(%arg0: i32, %arg1: i32) -> (i32, i32, i32) {
    %c0_i32 = arith.constant 0 : i32
    %c0_i32_0 = arith.constant 0 : i32
    return %arg0, %arg1, %c0_i32 : i32, i32, i32
  }
  func.func @transform_3(%arg0: i32, %arg1: i32) -> (i32, i32) {
    %c0_i32 = arith.constant 0 : i32
    %c0_i32_0 = arith.constant 0 : i32
    %c0_i32_1 = arith.constant 0 : i32
    return %c0_i32, %c0_i32_0 : i32, i32
  }
  func.func @transform_4(%arg0: i32, %arg1: i32) -> (i32, i32, i32) {
    %c0_i32 = arith.constant 0 : i32
    %c0_i32_0 = arith.constant 0 : i32
    return %arg0, %arg1, %c0_i32 : i32, i32, i32
  }
}

</mosaic_0001>

<bundles_post_ra>
// kernel: block_forward.4
= control target key start
LH: loop header
LB: loop body
LE: loop exit
PB: predicated region body
PF: predicated region fallthrough
CT: control target
= control target key end

     0   :  { %s724_s24 = smov 0   ;;  %s813_s0 = inlined_call_operand.vmem [shape: f32[2,8,128], index: 0, kind: input, shape index: {}]   ;;  %s814_s1 = inlined_call_operand.vmem [shape: f32[1,128], index: 1, kind: input, shape index: {}]   ;;  %s815_s2 = inlined_call_operand.vmem [shape: f32[1,128], index: 2, kind: input, shape index: {}]   ;;  %s816_s3 = inlined_call_operand.vmem [shape: f32[1,128], index: 3, kind: input, shape index: {}]   ;;  %s817_s4 = inlined_call_operand.vmem [shape: bf16[128,160], index: 4, kind: input, shape index: {}]   ;;  %s818_s5 = inlined_call_operand.vmem [shape: f32[2,8,128], index: 5, kind: output, shape index: {0}]   ;;  %s819_s6 = inlined_call_operand.vmem [shape: f32[2,8,128], index: 6, kind: output, shape index: {1}]   ;;  %s820_s7 = inlined_call_operand.vmem [shape: f32[2,8,160], index: 7, kind: output, shape index: {2}]  }
   0x1 LB: > { %s604_s25 = sadd.s32 4294967295, %s681_s24   ;;  %p608_p0 = scmp.ge.s32.totalorder %s681_s24, 1  ;;  %s681_s24 = sphi %s724_s24, %s18_s24  }
   0x2   : > { %p241_p1 = scmp.lt.s32.totalorder %s681_s24, 3 }
   0x4   : > { %p242_p2 = pnand %p608_p0, %p241_p1 }
   0x5   : > { %p280_p3 = scmp.lt.s32.totalorder (!%p242_p2), %s604_s25, 1 }
   0x6   : > { %245 = sbr.rel (%p242_p2) target bundleno = 542 (0x21e), region = 40 }
   0xb   : > { %s822_s25 = smov (!%p280_p3, %s604_s25), 1  ;;  %v645_v5 = vld [vmem:[%s817_s4 + $0x74] ss:$8 sps:$4 sm:$0xff]   ;;  %v647_v6 = vld [vmem:[%s817_s4 + $0x70] ss:$8 sps:$4 sm:$0xff]   ;;  %v683_v18 = vmov 0   ;;  %v328_v25 = vlaneseq }
   0xc   : > { %s735_s26 = sshll.u32 %s822_s25, 3  ;;  %441 = vmatprep.subr.bf16.mxu0 %v645_v5  ;;  %v648_v7 = vld [vmem:[%s817_s4 + $0x64] ss:$8 sps:$4 sm:$0xff]   ;;  %v650_v8 = vld [vmem:[%s817_s4 + $0x60] ss:$8 sps:$4 sm:$0xff]   ;;  %473 = vmatprep.mubr.bf16.mxu0 %v683_v18  ;;  %s635_s11 = sshll.u32 %s822_s25, 4 }
   0xd   : > { %s283_s29 = scalar_lea.vmem %s813_s0, %s735_s26  ;;  %442 = vmatpush1.bf16.msra.mxu0 %v647_v6  ;;  %v651_v9 = vld [vmem:[%s817_s4 + $0x54] ss:$8 sps:$4 sm:$0xff]   ;;  %v653_v10 = vld [vmem:[%s817_s4 + $0x50] ss:$8 sps:$4 sm:$0xff]   ;;  %v654_v11 = vld [vmem:[%s817_s4 + $0x44] ss:$8 sps:$4 sm:$0xff]   ;;  %s287_s28 = scalar_lea.vmem %s818_s5, %s735_s26 }
   0xe   : > { %v298_v0 = vld [vmem:[%s283_s29] sm:$0xff]  ;;  %443 = vmatprep.subr.bf16.mxu0 %v648_v7  ;;  %v657_v13 = vld [vmem:[%s817_s4 + $0x34] ss:$8 sps:$4 sm:$0xff]   ;;  %v659_v14 = vld [vmem:[%s817_s4 + $0x30] ss:$8 sps:$4 sm:$0xff]   ;;  %v329_v30 = vshrl.u32 %v328_v25, 7  ;;  %s291_s8 = scalar_lea.vmem %s819_s6, %s735_s26  ;;  %s296_s13 = scalar_lea.vmem %s820_s7, %s635_s11 }
   0xf   : > { %299 = vadd.xlane.f32.xlu0 %v298_v0  ;;  %v656_v12 = vld [vmem:[%s817_s4 + $0x40] ss:$8 sps:$4 sm:$0xff]   ;;  %v660_v15 = vld [vmem:[%s817_s4 + $0x24] ss:$8 sps:$4 sm:$0xff]   ;;  %v663_v17 = vld [vmem:[%s817_s4 + $0x14] ss:$8 sps:$4 sm:$0xff]  }
  0x10   : > { %v662_v16 = vld [vmem:[%s817_s4 + $0x20] ss:$8 sps:$4 sm:$0xff]   ;;  %v665_v19 = vld [vmem:[%s817_s4 + $0x10] ss:$8 sps:$4 sm:$0xff]   ;;  %v666_v20 = vld [vmem:[%s817_s4 + $0x4] ss:$8 sps:$4 sm:$0xff]  }
  0x11   : > { %444 = vmatpush1.bf16.msra.mxu0 %v650_v8  ;;  %v668_v21 = vld [vmem:[%s817_s4] ss:$8 sps:$4 sm:$0xff]   ;;  %vm330_vm0 = vcmp.eq.s32.totalorder %v329_v30, 0  ;;  %vm485_vm1 = vcmask 261120  }
  0x12   : > { %445 = vmatprep.subr.bf16.mxu0 %v651_v9  ;;  %v614_v27 = vld [vmem:[%s814_s1] ss:$0 sm:$0xff] }
  0x13   : > { %v615_v29 = vld [vmem:[%s815_s2] ss:$0 sm:$0xff] }
  0x14   : > { %v616_v35 = vld [vmem:[%s816_s3] ss:$0 sm:$0xff] }
  0x15   : > { %446 = vmatpush1.bf16.msra.mxu0 %v653_v10 }
  0x16   : > { %447 = vmatprep.subr.bf16.mxu0 %v654_v11 }
  0x19   : > { %448 = vmatpush1.bf16.msra.mxu0 %v656_v12 }
  0x1a   : > { %449 = vmatprep.subr.bf16.mxu0 %v657_v13 }
  0x1d   : > { %450 = vmatpush1.bf16.msra.mxu0 %v659_v14 }
  0x1e   : > { %451 = vmatprep.subr.bf16.mxu0 %v660_v15 }
  0x21   : > { %452 = vmatpush1.bf16.msra.mxu0 %v662_v16 }
  0x22   : > { %453 = vmatprep.subr.bf16.mxu0 %v663_v17 }
  0x25   : > { %454 = vmatpush1.bf16.msra.mxu0 %v665_v19 }
  0x26   : > { %455 = vmatprep.subr.bf16.mxu0 %v666_v20 }
  0x29   : > { %456 = vmatpush1.bf16.msra.mxu0 %v668_v21 }
  0x98   : > { %v300_v1 = vpop.xlane.xlu0 %299 }
  0x99   : > { %v302_v2 = vmul.f32 0.0078125, %v300_v1 }
  0x9b   : > { %v303_v3 = vsub.f32 %v298_v0, %v302_v2 }
  0x9d   : > { %v304_v4 = vmul.f32 %v303_v3, %v303_v3 }
  0x9f   : > { %305 = vadd.xlane.f32.xlu0 %v304_v4 }
 0x128   : > { %v306_v22 = vpop.xlane.xlu0 %305 }
 0x129   : > { %v307_v23 = vmul.f32 0.0078125, %v306_v22 }
 0x12b   : > { %v308_v24 = vadd.f32 1e-05, %v307_v23 }
 0x12d   : > { %669 = vrsqrt.f32 %v308_v24 }
 0x13a   : > { %v670_v26 = vpop.eup %669 }
 0x13b   : > { %v310_v28 = vmul.f32 %v670_v26, %v303_v3 }
 0x13d   : > { %v318_v31 = vmul.f32 %v614_v27, %v310_v28 }
 0x13f   : > { %v326_v32 = vadd.f32 %v615_v29, %v318_v31 }
 0x141   : > { %v327_v33 = vrot.slane %v326_v32, 7  ;;  %342 = vst [vmem:[%s287_s28] sm:$0xff] %v326_v32 }
 0x143   : > { %v331_v34 = vsel %vm330_vm0, 0.0, %v327_v33 }
 0x144   : > { %v332_v36 = vsub.f32 %v331_v34, %v326_v32 }
 0x146   : > { %v340_v37 = vmul.f32 %v616_v35, %v332_v36  ;;  %343 = vst [vmem:[%s291_s8] sm:$0xff] %v332_v36 }
 0x148   : > { %v341_v38 = vadd.f32 %v340_v37, %v326_v32 }
 0x14a   : > { %v344_v39 = vpack.c.bf16 %v341_v38, %v341_v38 }
 0x14c   : > { %474 = vmatmul.mubr.bf16.vlgmr.msra.gmra.mxu0 %v344_v39 }
 0x20c   : > { %v475_v40 = vpop.f32.mrf.mxu0 }
 0x20d   : > { %671 = vtanh.f32 %v475_v40 }
 0x20e   : > { %v477_v41 = vpop.f32.mrf.mxu0 }
 0x20f   : > { %673 = vtanh.f32 %v477_v41 }
 0x210   : > { %v479_v42 = vpop.f32.mrf.mxu0 }
 0x212   : > { %v480_v43 = vpop.f32.mrf.mxu0 }
 0x21a   : > { %v672_v44 = vpop.eup %671 }
 0x21b   : > { %484 = vst [vmem:[%s296_s13] sm:$0xff] %v672_v44 }
 0x21c   : > { %v674_v45 = vpop.eup %673 }
 0x21d   : > { %486 = vst.msk [vmem:[%s296_s13 + $0x8] sm:$0xff] %vm485_vm1, %v674_v45 }
 0x21e PF: > { %s18_s24 = sadd.s32 1, %s681_s24  }
 0x21f   : > { %p15_p4 = scmp.ge.s32.totalorder %s18_s24, 4  }
 0x221   :  { %17 = sbr.rel (!%p15_p4) target bundleno = 1 (0x1), region = 94 }

// kernel: block_forward.7
= control target key start
LH: loop header
LB: loop body
LE: loop exit
PB: predicated region body
PF: predicated region fallthrough
CT: control target
= control target key end

     0   :  { %s1219_s15 = smov 64   ;;  %vm39_vm0 = vcmask 523264   ;;  %s1575_s0 = inlined_call_operand.vmem [shape: f32[16,128], index: 0, kind: input, shape index: {}]   ;;  %s1576_s1 = inlined_call_operand.vmem [shape: f32[16,128], index: 1, kind: input, shape index: {}]   ;;  %s1577_s2 = inlined_call_operand.vmem [shape: f32[16,128], index: 2, kind: input, shape index: {}]   ;;  %s1578_s3 = inlined_call_operand.vmem [shape: f32[1,128], index: 3, kind: input, shape index: {}]   ;;  %s1579_s4 = inlined_call_operand.vmem [shape: f32[1,128], index: 4, kind: input, shape index: {}]   ;;  %s1580_s5 = inlined_call_operand.vmem [shape: bf16[128,128], index: 5, kind: input, shape index: {}]   ;;  %s1581_s6 = inlined_call_operand.vmem [shape: f32[1,128], index: 6, kind: input, shape index: {}]   ;;  %s1582_s7 = inlined_call_operand.vmem [shape: f32[1,128], index: 7, kind: input, shape index: {}]   ;;  %s1583_s8 = inlined_call_operand.vmem [shape: bf16[128,512], index: 8, kind: input, shape index: {}]   ;;  %s1584_s9 = inlined_call_operand.vmem [shape: bf16[512,128], index: 9, kind: input, shape index: {}]   ;;  %s1585_s10 = inlined_call_operand.hbm [shape: f32[16,128], index: 10, kind: output, shape index: {}]  }
   0x1   :  { %v37_v0 = vld [vmem:[%s1575_s0] sm:$0xff]  ;;  %v38_v1 = vld [vmem:[%s1575_s0 + $0x8] sm:$0xff] }
   0x2   :  { %69 = vrot.lane.b32.xlu0 %v37_v0, %s1219_s15  ;;  %v40_v2 = vsel %vm39_vm0, %v37_v0, 0.0 }
   0x6   :  { %71 = vrot.lane.b32.xlu0 %v38_v1, %s1219_s15 }
  0x25   :  { %41 = vadd.xlane.f32.xlu0 %v40_v2 }
  0x26   :  { %15 = vsyncpa [#allocation3], 0  ;;  %v43_v7 = vsel %vm39_vm0, %v38_v1, 0.0  ;;  %v1097_v30 = vld [vmem:[%s1580_s5 + $0x38] sm:$0xff]   ;;  %v1220_v31 = vmov 0.0   ;;  %v1098_v32 = vld [vmem:[%s1580_s5 + $0x30] sm:$0xff]  }
  0x27   :  { %1070 = vmatprep.subr.bf16.mxu0 %v1220_v31  ;;  %v1099_v33 = vld [vmem:[%s1580_s5 + $0x28] sm:$0xff]   ;;  %vm1221_vm1 = vmmov 0   ;;  %v1100_v34 = vld [vmem:[%s1580_s5 + $0x20] sm:$0xff]   ;;  %v1101_v35 = vld [vmem:[%s1580_s5 + $0x18] sm:$0xff]  }
  0x28   :  { %1071 = vmatpush3.bf16.msra.mxu0 %v1097_v30  ;;  %1086 = vmatprep.mubr.msk.bf16.mxu0 %vm1221_vm1, %v1220_v31  ;;  %v1102_v36 = vld [vmem:[%s1580_s5 + $0x10] sm:$0xff]   ;;  %v1103_v37 = vld [vmem:[%s1580_s5 + $0x8] sm:$0xff]   ;;  %v1104_v38 = vld [vmem:[%s1580_s5] sm:$0xff]  }
  0x29   :  { %1072 = vmatprep.subr.bf16.mxu0 %v1220_v31  ;;  %v941_v55 = vld [vmem:[%s1578_s3] ss:$0 sm:$0xff]  ;;  %v1113_v30 = vld [vmem:[%s1583_s8 + $0xc8] ss:$16 sps:$4 sm:$0xff]  }
  0x2a   :  { %v942_v62 = vld [vmem:[%s1579_s4] ss:$0 sm:$0xff] }
  0x2b   :  { %v129_v2 = vld [vmem:[%s1576_s1] sm:$0xff] }
  0x2c   :  { %1073 = vmatpush3.bf16.msra.mxu0 %v1098_v32  ;;  %v1117_v32 = vld [vmem:[%s1583_s8 + $0xa4] ss:$16 sps:$4 sm:$0xff]  }
  0x2d   :  { %1074 = vmatprep.subr.bf16.mxu0 %v1220_v31 }
  0x30   :  { %1075 = vmatpush3.bf16.msra.mxu0 %v1099_v33  ;;  %v1121_v33 = vld [vmem:[%s1583_s8 + $0xac] ss:$16 sps:$4 sm:$0xff]  }
  0x31   :  { %1076 = vmatprep.subr.bf16.mxu0 %v1220_v31 }
  0x34   :  { %1077 = vmatpush3.bf16.msra.mxu0 %v1100_v34  ;;  %v1119_v34 = vld [vmem:[%s1583_s8 + $0xa8] ss:$16 sps:$4 sm:$0xff]  }
  0x35   :  { %1078 = vmatprep.subr.bf16.mxu0 %v1220_v31 }
  0x38   :  { %1079 = vmatpush3.bf16.msra.mxu0 %v1101_v35  ;;  %v1122_v35 = vld [vmem:[%s1583_s8 + $0xa0] ss:$16 sps:$4 sm:$0xff]  }
  0x39   :  { %1080 = vmatprep.subr.bf16.mxu0 %v1220_v31 }
  0x3c   :  { %1081 = vmatpush3.bf16.msra.mxu0 %v1102_v36  ;;  %v1123_v36 = vld [vmem:[%s1583_s8 + $0x84] ss:$16 sps:$4 sm:$0xff]  }
  0x3d   :  { %1082 = vmatprep.subr.bf16.mxu0 %v1220_v31 }
  0x40   :  { %1083 = vmatpush3.bf16.msra.mxu0 %v1103_v37  ;;  %v1125_v37 = vld [vmem:[%s1583_s8 + $0x88] ss:$16 sps:$4 sm:$0xff]  }
  0x41   :  { %1084 = vmatprep.subr.bf16.mxu0 %v1220_v31  ;;  %v1116_v31 = vld [vmem:[%s1583_s8 + $0xc0] ss:$16 sps:$4 sm:$0xff]  }
  0x44   :  { %1085 = vmatpush3.bf16.msra.mxu0 %v1104_v38  ;;  %v1127_v38 = vld [vmem:[%s1583_s8 + $0x8c] ss:$16 sps:$4 sm:$0xff]  }
  0x74   :  { %v70_v3 = vpop.permute.xlu0 %69 }
  0x75   :  { %v75_v4 = vsel %vm39_vm0, %v70_v3, 0.0  ;;  %v130_v3 = vld [vmem:[%s1576_s1 + $0x8] sm:$0xff] }
  0x76   :  { %76 = vadd.xlane.f32.xlu1 %v75_v4 }
  0x78   :  { %v72_v5 = vpop.permute.xlu0 %71 }
  0x79   :  { %v78_v6 = vsel %vm39_vm0, %v72_v5, 0.0 }
  0x7a   :  { %79 = vadd.xlane.f32.xlu1 %v78_v6 }
  0x7e   :  { %44 = vadd.xlane.f32.xlu1 %v43_v7 }
  0xae   :  { %v42_v21 = vpop.xlane.xlu0 %41 }
  0xaf   :  { %v47_v22 = vmul.f32 0.015625, %v42_v21 }
  0xb1   :  { %v49_v23 = vsub.f32 %v37_v0, %v47_v22 }
  0xb3   :  { %v51_v24 = vmul.f32 %v49_v23, %v49_v23 }
  0xb5   :  { %v53_v25 = vsel %vm39_vm0, %v51_v24, 0.0 }
  0xff   :  { %v77_v8 = vpop.xlane.xlu1 %76 }
 0x100   :  { %v81_v9 = vmul.f32 0.015625, %v77_v8  ;;  %v239_v8 = vld [vmem:[%s1577_s2] sm:$0xff] }
 0x102   :  { %v1291_v10 = vsub.f32 %v37_v0, %v81_v9 }
 0x103   :  { %v80_v11 = vpop.xlane.xlu1 %79 }
 0x104   :  { %v82_v12 = vmul.f32 0.015625, %v80_v11  ;;  %v85_v13 = vmul.f32 %v1291_v10, %v1291_v10 }
 0x106   :  { %v1295_v14 = vsub.f32 %v38_v1, %v82_v12  ;;  %89 = vrot.lane.b32.xlu1 %v85_v13, %s1219_s15  ;;  %v240_v12 = vld [vmem:[%s1577_s2 + $0x8] sm:$0xff] }
 0x107   :  { %v45_v15 = vpop.xlane.xlu1 %44 }
 0x108   :  { %v48_v16 = vmul.f32 0.015625, %v45_v15  ;;  %v86_v17 = vmul.f32 %v1295_v14, %v1295_v14 }
 0x10a   :  { %v1299_v18 = vsub.f32 %v38_v1, %v48_v16  ;;  %91 = vrot.lane.b32.xlu1 %v86_v17, %s1219_s15  ;;  %v1105_v16 = vld [vmem:[%s1583_s8 + $0xe4] ss:$16 sps:$4 sm:$0xff]   ;;  %v1107_v17 = vld [vmem:[%s1583_s8 + $0xe8] ss:$16 sps:$4 sm:$0xff]  }
 0x10b   :  { %477 = vmatprep.subr.bf16.mxu1 %v1105_v16  ;;  %v1157_v16 = vld [vmem:[%s1584_s9 + $0x70] sm:$0xff]  }
 0x10c   :  { %v52_v19 = vmul.f32 %v1299_v18, %v1299_v18 }
 0x10e   :  { %v56_v20 = vsel %vm39_vm0, %v52_v19, 0.0  ;;  %v1110_v19 = vld [vmem:[%s1583_s8 + $0xe0] ss:$16 sps:$4 sm:$0xff]  }
 0x10f   :  { %57 = vadd.xlane.f32.xlu0 %v56_v20  ;;  %478 = vmatpush1.bf16.msra.mxu1 %v1110_v19  ;;  %v1160_v19 = vld [vmem:[%s1584_s9 + $0xb0] sm:$0xff]  }
 0x12e   :  { %54 = vadd.xlane.f32.xlu1 %v53_v25 }
 0x178   :  { %v90_v26 = vpop.permute.xlu1 %89 }
 0x179   :  { %v95_v27 = vsel %vm39_vm0, %v90_v26, 0.0 }
 0x17a   :  { %96 = vadd.xlane.f32.xlu0 %v95_v27 }
 0x17c   :  { %v92_v28 = vpop.permute.xlu1 %91 }
 0x17d   :  { %v98_v29 = vsel %vm39_vm0, %v92_v28, 0.0  ;;  %v1111_v28 = vld [vmem:[%s1583_s8 + $0xc4] ss:$16 sps:$4 sm:$0xff]  }
 0x17e   :  { %99 = vadd.xlane.f32.xlu0 %v98_v29  ;;  %v1115_v29 = vld [vmem:[%s1583_s8 + $0xcc] ss:$16 sps:$4 sm:$0xff]   ;;  %479 = vmatprep.subr.bf16.mxu1 %v1111_v28 }
 0x17f   :  { %480 = vmatpush1.bf16.msra.mxu1 %v1116_v31  ;;  %v1169_v28 = vld [vmem:[%s1584_s9 + $0x58] sm:$0xff]  }
 0x180   :  { %481 = vmatprep.subr.bf16.mxu1 %v1117_v32  ;;  %v1172_v31 = vld [vmem:[%s1584_s9 + $0x98] sm:$0xff]   ;;  %v1173_v32 = vld [vmem:[%s1584_s9 + $0x50] sm:$0xff]  }
 0x183   :  { %482 = vmatpush1.bf16.msra.mxu1 %v1122_v35  ;;  %v1176_v35 = vld [vmem:[%s1584_s9 + $0x90] sm:$0xff]  }
 0x184   :  { %483 = vmatprep.subr.bf16.mxu1 %v1123_v36  ;;  %v1177_v36 = vld [vmem:[%s1584_s9 + $0x48] sm:$0xff]  }
 0x198   :  { %v58_v41 = vpop.xlane.xlu0 %57 }
 0x199   :  { %v60_v42 = vmul.f32 0.015625, %v58_v41  ;;  %v1133_v41 = vld [vmem:[%s1583_s8 + $0x6c] ss:$16 sps:$4 sm:$0xff]  }
 0x19b   :  { %v62_v46 = vadd.f32 2e-05, %v60_v42  ;;  %v1131_v42 = vld [vmem:[%s1583_s8 + $0x68] ss:$16 sps:$4 sm:$0xff]  }
 0x1b7   :  { %v55_v39 = vpop.xlane.xlu1 %54 }
 0x1b8   :  { %v59_v40 = vmul.f32 0.015625, %v55_v39  ;;  %v1128_v39 = vld [vmem:[%s1583_s8 + $0x80] ss:$16 sps:$4 sm:$0xff]  }
 0x1b9   :  { %484 = vmatpush1.bf16.msra.mxu1 %v1128_v39  ;;  %v1180_v39 = vld [vmem:[%s1584_s9 + $0x88] sm:$0xff]  }
 0x1ba   :  { %v61_v43 = vadd.f32 2e-05, %v59_v40  ;;  %v1129_v40 = vld [vmem:[%s1583_s8 + $0x64] ss:$16 sps:$4 sm:$0xff]  }
 0x1bb   :  { %485 = vmatprep.subr.bf16.mxu1 %v1129_v40  ;;  %v1181_v40 = vld [vmem:[%s1584_s9 + $0x40] sm:$0xff]  }
 0x1bc   :  { %1185 = vrsqrt.f32 %v61_v43  ;;  %v1134_v43 = vld [vmem:[%s1583_s8 + $0x60] ss:$16 sps:$4 sm:$0xff]  }
 0x1bd   :  { %486 = vmatpush1.bf16.msra.mxu1 %v1134_v43  ;;  %v1184_v43 = vld [vmem:[%s1584_s9 + $0x80] sm:$0xff]  }
 0x1c9   :  { %v1186_v51 = vpop.eup %1185 }
 0x1ca   :  { %v65_v53 = vmul.f32 %v1186_v51, %v49_v23  ;;  %v1143_v51 = vld [vmem:[%s1583_s8 + $0x28] ss:$16 sps:$4 sm:$0xff]  }
 0x203   :  { %v97_v44 = vpop.xlane.xlu0 %96 }
 0x204   :  { %v101_v45 = vmul.f32 0.015625, %v97_v44  ;;  %v1135_v44 = vld [vmem:[%s1583_s8 + $0x44] ss:$16 sps:$4 sm:$0xff]  }
 0x205   :  { %487 = vmatprep.subr.bf16.mxu1 %v1135_v44 }
 0x206   :  { %v103_v47 = vadd.f32 2e-05, %v101_v45  ;;  %v1139_v45 = vld [vmem:[%s1583_s8 + $0x4c] ss:$16 sps:$4 sm:$0xff]  }
 0x207   :  { %v100_v48 = vpop.xlane.xlu0 %99 }
 0x208   :  { %1187 = vrsqrt.f32 %v103_v47  ;;  %v102_v49 = vmul.f32 0.015625, %v100_v48  ;;  %v1140_v47 = vld [vmem:[%s1583_s8 + $0x40] ss:$16 sps:$4 sm:$0xff]   ;;  %v1141_v48 = vld [vmem:[%s1583_s8 + $0x24] ss:$16 sps:$4 sm:$0xff]  }
 0x209   :  { %1189 = vrsqrt.f32 %v62_v46  ;;  %v1137_v46 = vld [vmem:[%s1583_s8 + $0x48] ss:$16 sps:$4 sm:$0xff]   ;;  %488 = vmatpush1.bf16.msra.mxu1 %v1140_v47 }
 0x20a   :  { %v104_v50 = vadd.f32 2e-05, %v102_v49  ;;  %v1145_v49 = vld [vmem:[%s1583_s8 + $0x2c] ss:$16 sps:$4 sm:$0xff]   ;;  %489 = vmatprep.subr.bf16.mxu1 %v1141_v48 }
 0x20c   :  { %1191 = vrsqrt.f32 %v104_v50  ;;  %v1222_v50 = vmov 0  }
 0x20d   :  { %509 = vmatprep.mubr.bf16.mxu1 %v1222_v50 }
 0x215   :  { %v1188_v52 = vpop.eup %1187 }
 0x216   :  { %v107_v54 = vmul.f32 %v1188_v52, %v1291_v10  ;;  %v1190_v56 = vpop.eup %1189  ;;  %v1146_v52 = vld [vmem:[%s1583_s8 + $0x20] ss:$16 sps:$4 sm:$0xff]  }
 0x217   :  { %v66_v60 = vmul.f32 %v1190_v56, %v1299_v18  ;;  %v1109_v18 = vld [vmem:[%s1583_s8 + $0xec] ss:$16 sps:$4 sm:$0xff]   ;;  %490 = vmatpush1.bf16.msra.mxu1 %v1146_v52  ;;  %v1152_v56 = vld [vmem:[%s1583_s8] ss:$16 sps:$4 sm:$0xff]  }
 0x218   :  { %v109_v57 = vsel %vm39_vm0, %v65_v53, %v107_v54  ;;  %520 = vmatprep.subr.bf16.mxu0 %v1109_v18  ;;  %v1147_v53 = vld [vmem:[%s1583_s8 + $0x4] ss:$16 sps:$4 sm:$0xff]   ;;  %v1151_v54 = vld [vmem:[%s1583_s8 + $0xc] ss:$16 sps:$4 sm:$0xff]  }
 0x219   :  { %v1192_v58 = vpop.eup %1191  ;;  %v118_v59 = vmul.f32 %v941_v55, %v109_v57  ;;  %491 = vmatprep.subr.bf16.mxu1 %v1147_v53  ;;  %v1153_v57 = vld [vmem:[%s1584_s9 + $0x78] sm:$0xff]   ;;  %v1159_v18 = vld [vmem:[%s1584_s9 + $0x30] sm:$0xff]  }
 0x21a   :  { %v108_v61 = vmul.f32 %v1192_v58, %v1295_v14  ;;  %v1154_v58 = vld [vmem:[%s1584_s9 + $0xf8] sm:$0xff]  }
 0x21b   :  { %v127_v1 = vadd.f32 %v942_v62, %v118_v59  ;;  %492 = vmatpush1.bf16.msra.mxu1 %v1152_v56 }
 0x21c   :  { %v110_v63 = vsel %vm39_vm0, %v66_v60, %v108_v61  ;;  %1026 = vmatprep.subr.bf16.mxu1 %v1153_v57 }
 0x21d   :  { %v119_v0 = vmul.f32 %v941_v55, %v110_v63  ;;  %v131_v5 = vmul.f32 %v129_v2, %v127_v1  ;;  %v1149_v55 = vld [vmem:[%s1583_s8 + $0x8] ss:$16 sps:$4 sm:$0xff]  }
 0x21f   :  { %v128_v4 = vadd.f32 %v942_v62, %v119_v0 }
 0x221   :  { %v132_v6 = vmul.f32 %v130_v3, %v128_v4  ;;  %v951_v3 = vld [vmem:[%s1581_s6] ss:$0 sm:$0xff] }
 0x223   :  { %v133_v7 = vpack.c.bf16 %v132_v6, %v131_v5 }
 0x225   :  { %1087 = vmatmul.mubr.bf16.vlgmr.msra.gmra.mxu0 %v133_v7  ;;  %v952_v7 = vld [vmem:[%s1582_s7] ss:$0 sm:$0xff] }
 0x226   :  { %521 = vmatpush1.bf16.msra.mxu0 %v1107_v17  ;;  %552 = vmatprep.mubr.bf16.mxu0 %v1222_v50  ;;  %v1158_v17 = vld [vmem:[%s1584_s9 + $0xf0] sm:$0xff]  }
 0x227   :  { %522 = vmatprep.subr.bf16.mxu0 %v1115_v29  ;;  %v1170_v29 = vld [vmem:[%s1584_s9 + $0xd8] sm:$0xff]  }
 0x22a   :  { %523 = vmatpush1.bf16.msra.mxu0 %v1113_v30  ;;  %v1171_v30 = vld [vmem:[%s1584_s9 + $0x18] sm:$0xff]  }
 0x22b   :  { %524 = vmatprep.subr.bf16.mxu0 %v1121_v33  ;;  %v1174_v33 = vld [vmem:[%s1584_s9 + $0xd0] sm:$0xff]  }
 0x22e   :  { %525 = vmatpush1.bf16.msra.mxu0 %v1119_v34  ;;  %v1175_v34 = vld [vmem:[%s1584_s9 + $0x10] sm:$0xff]  }
 0x22f   :  { %526 = vmatprep.subr.bf16.mxu0 %v1127_v38  ;;  %v1179_v38 = vld [vmem:[%s1584_s9 + $0x8] sm:$0xff]  }
 0x232   :  { %527 = vmatpush1.bf16.msra.mxu0 %v1125_v37  ;;  %v1178_v37 = vld [vmem:[%s1584_s9 + $0xc8] sm:$0xff]  }
 0x233   :  { %528 = vmatprep.subr.bf16.mxu0 %v1133_v41  ;;  %v1182_v41 = vld [vmem:[%s1584_s9 + $0xc0] sm:$0xff]  }
 0x236   :  { %529 = vmatpush1.bf16.msra.mxu0 %v1131_v42  ;;  %v1183_v42 = vld [vmem:[%s1584_s9] sm:$0xff]  }
 0x237   :  { %530 = vmatprep.subr.bf16.mxu0 %v1139_v45 }
 0x23a   :  { %531 = vmatpush1.bf16.msra.mxu0 %v1137_v46 }
 0x23b   :  { %532 = vmatprep.subr.bf16.mxu0 %v1145_v49 }
 0x23e   :  { %533 = vmatpush1.bf16.msra.mxu0 %v1143_v51 }
 0x23f   :  { %534 = vmatprep.subr.bf16.mxu0 %v1151_v54 }
 0x242   :  { %535 = vmatpush1.bf16.msra.mxu0 %v1149_v55 }
 0x243   :  { %1048 = vmatprep.subr.bf16.mxu0 %v1154_v58 }
 0x2e5   :  { %v232_v9 = vpop.f32.mrf.mxu0 }
 0x2e6   :  { %v1351_v10 = vadd.f32 %v239_v8, %v232_v9 }
 0x2e7   :  { %v1088_v11 = vpop.f32.mrf.mxu0 }
 0x2e8   :  { %243 = vadd.xlane.f32.xlu0 %v1351_v10 }
 0x2e9   :  { %v235_v13 = vpop.f32.mrf.mxu0 }
 0x2ea   :  { %v1357_v14 = vadd.f32 %v240_v12, %v235_v13  ;;  %v1155_v12 = vld [vmem:[%s1584_s9 + $0x38] sm:$0xff]  }
 0x2eb   :  { %v1089_v15 = vpop.f32.mrf.mxu0  ;;  %v1156_v13 = vld [vmem:[%s1584_s9 + $0xb8] sm:$0xff]  }
 0x2ec   :  { %245 = vadd.xlane.f32.xlu0 %v1357_v14 }
 0x371   :  { %v244_v20 = vpop.xlane.xlu0 %243 }
 0x372   :  { %v248_v21 = vmul.f32 0.0078125, %v244_v20  ;;  %v1161_v20 = vld [vmem:[%s1584_s9 + $0x68] sm:$0xff]  }
 0x374   :  { %v1373_v22 = vsub.f32 %v1351_v10, %v248_v21  ;;  %v1162_v21 = vld [vmem:[%s1584_s9 + $0xe8] sm:$0xff]  }
 0x375   :  { %v246_v23 = vpop.xlane.xlu0 %245 }
 0x376   :  { %v249_v24 = vmul.f32 0.0078125, %v246_v23  ;;  %v252_v25 = vmul.f32 %v1373_v22, %v1373_v22  ;;  %v1164_v23 = vld [vmem:[%s1584_s9 + $0xa8] sm:$0xff]  }
 0x378   :  { %v1378_v26 = vsub.f32 %v1357_v14, %v249_v24  ;;  %254 = vadd.xlane.f32.xlu0 %v252_v25  ;;  %v1165_v24 = vld [vmem:[%s1584_s9 + $0x60] sm:$0xff]  }
 0x379   :  { %v1166_v25 = vld [vmem:[%s1584_s9 + $0xe0] sm:$0xff]  }
 0x37a   :  { %v253_v27 = vmul.f32 %v1378_v26, %v1378_v26 }
 0x37c   :  { %256 = vadd.xlane.f32.xlu0 %v253_v27  ;;  %v1168_v27 = vld [vmem:[%s1584_s9 + $0xa0] sm:$0xff]  }
 0x401   :  { %v255_v59 = vpop.xlane.xlu0 %254 }
 0x402   :  { %v258_v60 = vmul.f32 0.0078125, %v255_v59 }
 0x404   :  { %v260_v61 = vadd.f32 1e-05, %v258_v60 }
 0x405   :  { %v257_v62 = vpop.xlane.xlu0 %256 }
 0x406   :  { %1193 = vrsqrt.f32 %v260_v61  ;;  %v259_v63 = vmul.f32 0.0078125, %v257_v62 }
 0x408   :  { %v261_v0 = vadd.f32 1e-05, %v259_v63 }
 0x40a   :  { %1195 = vrsqrt.f32 %v261_v0 }
 0x413   :  { %v1194_v1 = vpop.eup %1193 }
 0x414   :  { %v264_v2 = vmul.f32 %v1194_v1, %v1373_v22  ;;  %v1163_v22 = vld [vmem:[%s1584_s9 + $0x28] sm:$0xff]  }
 0x416   :  { %v273_v6 = vmul.f32 %v951_v3, %v264_v2 }
 0x417   :  { %v1196_v4 = vpop.eup %1195 }
 0x418   :  { %v265_v5 = vmul.f32 %v1196_v4, %v1378_v26  ;;  %v282_v9 = vadd.f32 %v952_v7, %v273_v6  ;;  %v1167_v26 = vld [vmem:[%s1584_s9 + $0x20] sm:$0xff]   ;;  %s1223_s9 = smov [#allocation2]  }
 0x419   :  { %s930_s0 = sshll.u32 %s1223_s9, 4  ;;  %s931_s0 = int_to_ptr.vmem [resolvable:$true] %s930_s0 }
 0x41a   :  { %v274_v8 = vmul.f32 %v951_v3, %v265_v5  ;;  %s1197_s18 = scalar_lea.vmem %s931_s0, 256  ;;  %p1202_p1 = scmp.lt.s32.totalorder %s931_s0, %s931_s0 }
 0x41b   :  { %p1198_p0 = scmp.ne.s32.totalorder %s931_s0, %s1197_s18  ;;  %p1203_p2 = scmp.lt.s32.totalorder %s1197_s18, %s1197_s18 }
 0x41c   :  { %v283_v11 = vadd.f32 %v952_v7, %v274_v8 }
 0x41d   :  { %p1204_p3 = por %p1203_p2, %p1202_p1 }
 0x41e   :  { %v284_v15 = vpack.c.bf16 %v283_v11, %v282_v9 }
 0x41f   :  { %p1205_p4 = pnand %p1204_p3, %p1198_p0 }
 0x420   :  { %510 = vmatmul.mubr.bf16.vlgmr.msra.gmra.mxu1 %v284_v15  ;;  %553 = vmatmul.mubr.bf16.vlgmr.msra.gmra.mxu0 %v284_v15 }
 0x421   :  { %1027 = vmatpush3.bf16.msra.mxu1 %v1155_v12  ;;  %1049 = vmatpush3.bf16.msra.mxu0 %v1156_v13 }
 0x422   :  { %1028 = vmatprep.subr.bf16.mxu1 %v1157_v16  ;;  %1050 = vmatprep.subr.bf16.mxu0 %v1158_v17 }
 0x425   :  { %1029 = vmatpush3.bf16.msra.mxu1 %v1159_v18  ;;  %1051 = vmatpush3.bf16.msra.mxu0 %v1160_v19 }
 0x426   :  { %1030 = vmatprep.subr.bf16.mxu1 %v1161_v20  ;;  %1052 = vmatprep.subr.bf16.mxu0 %v1162_v21 }
 0x429   :  { %1031 = vmatpush3.bf16.msra.mxu1 %v1163_v22  ;;  %1053 = vmatpush3.bf16.msra.mxu0 %v1164_v23 }
 0x42a   :  { %1032 = vmatprep.subr.bf16.mxu1 %v1165_v24  ;;  %1054 = vmatprep.subr.bf16.mxu0 %v1166_v25 }
 0x42d   :  { %1033 = vmatpush3.bf16.msra.mxu1 %v1167_v26  ;;  %1055 = vmatpush3.bf16.msra.mxu0 %v1168_v27 }
 0x42e   :  { %1034 = vmatprep.subr.bf16.mxu1 %v1169_v28  ;;  %1056 = vmatprep.subr.bf16.mxu0 %v1170_v29 }
 0x431   :  { %1035 = vmatpush3.bf16.msra.mxu1 %v1171_v30  ;;  %1057 = vmatpush3.bf16.msra.mxu0 %v1172_v31 }
 0x432   :  { %1036 = vmatprep.subr.bf16.mxu1 %v1173_v32  ;;  %1058 = vmatprep.subr.bf16.mxu0 %v1174_v33 }
 0x435   :  { %1037 = vmatpush3.bf16.msra.mxu1 %v1175_v34  ;;  %1059 = vmatpush3.bf16.msra.mxu0 %v1176_v35 }
 0x436   :  { %1038 = vmatprep.subr.bf16.mxu1 %v1177_v36  ;;  %1060 = vmatprep.subr.bf16.mxu0 %v1178_v37 }
 0x439   :  { %1039 = vmatpush3.bf16.msra.mxu1 %v1179_v38  ;;  %1061 = vmatpush3.bf16.msra.mxu0 %v1180_v39 }
 0x43a   :  { %1040 = vmatprep.subr.bf16.mxu1 %v1181_v40  ;;  %1062 = vmatprep.subr.bf16.mxu0 %v1182_v41 }
 0x43d   :  { %1041 = vmatpush3.bf16.msra.mxu1 %v1183_v42  ;;  %1063 = vmatpush3.bf16.msra.mxu0 %v1184_v43 }
 0x4e0   :  { %v511_v44 = vpop.f32.mrf.mxu1  ;;  %v554_v45 = vpop.f32.mrf.mxu0 }
 0x4e1   :  { %v563_v54 = vmax.f32 %v511_v44, 0.0  ;;  %v565_v55 = vmax.f32 %v554_v45, 0.0 }
 0x4e2   :  { %v513_v46 = vpop.f32.mrf.mxu1  ;;  %v556_v47 = vpop.f32.mrf.mxu0 }
 0x4e3   :  { %v564_v50 = vmax.f32 %v513_v46, 0.0  ;;  %v566_v51 = vmax.f32 %v556_v47, 0.0  ;;  %v571_v2 = vmul.f32 %v563_v54, %v563_v54  ;;  %v573_v3 = vmul.f32 %v565_v55, %v565_v55 }
 0x4e4   :  { %v515_v48 = vpop.f32.mrf.mxu1  ;;  %v558_v49 = vpop.f32.mrf.mxu0 }
 0x4e5   :  { %v567_v52 = vmax.f32 %v515_v48, 0.0  ;;  %v569_v53 = vmax.f32 %v558_v49, 0.0  ;;  %v572_v62 = vmul.f32 %v564_v50, %v564_v50  ;;  %v574_v63 = vmul.f32 %v566_v51, %v566_v51 }
 0x4e6   :  { %v517_v56 = vpop.f32.mrf.mxu1  ;;  %v560_v57 = vpop.f32.mrf.mxu0 }
 0x4e7   :  { %v568_v58 = vmax.f32 %v517_v56, 0.0  ;;  %v570_v59 = vmax.f32 %v560_v57, 0.0  ;;  %v575_v60 = vmul.f32 %v567_v52, %v567_v52  ;;  %v577_v61 = vmul.f32 %v569_v53, %v569_v53 }
 0x4e9   :  { %v576_v0 = vmul.f32 %v568_v58, %v568_v58  ;;  %v578_v1 = vmul.f32 %v570_v59, %v570_v59  ;;  %v579_v6 = vpack.c.bf16 %v575_v60, %v571_v2  ;;  %v581_v7 = vpack.c.bf16 %v577_v61, %v573_v3 }
 0x4eb   :  { %v580_v4 = vpack.c.bf16 %v576_v0, %v572_v62  ;;  %v582_v5 = vpack.c.bf16 %v578_v1, %v574_v63 }
 0x4ed   :  { %871 = vmatprep.mubr.bf16.mxu1 %v580_v4  ;;  %912 = vmatprep.mubr.bf16.mxu0 %v582_v5 }
 0x4ee   :  { %872 = vmatmul.mubr.bf16.vlgmr.msra.gmra.mxu1 %v579_v6  ;;  %913 = vmatmul.mubr.bf16.vlgmr.msra.gmra.mxu0 %v581_v7 }
 0x5ae   :  { %v1042_v8 = vpop.f32.mrf.mxu1  ;;  %v1064_v9 = vpop.f32.mrf.mxu0 }
 0x5b0   :  { %v1043_v11 = vpop.f32.mrf.mxu1  ;;  %v1065_v12 = vpop.f32.mrf.mxu0 }
 0x5b1   :  { %v1044_v13 = vadd.f32 %v1043_v11, %v1042_v8  ;;  %v1066_v15 = vadd.f32 %v1065_v12, %v1064_v9 }
 0x5b2   :  { %v1045_v16 = vpop.f32.mrf.mxu1  ;;  %v1067_v17 = vpop.f32.mrf.mxu0 }
 0x5b3   :  { %v915_v18 = vadd.f32 %v1066_v15, %v1044_v13 }
 0x5b4   :  { %v1046_v19 = vpop.f32.mrf.mxu1  ;;  %v1068_v20 = vpop.f32.mrf.mxu0 }
 0x5b5   :  { %v921_v21 = vadd.f32 %v915_v18, %v1351_v10  ;;  %v1047_v22 = vadd.f32 %v1046_v19, %v1045_v16  ;;  %v1069_v23 = vadd.f32 %v1068_v20, %v1067_v17 }
 0x5b7   :  { %923 = vst [vmem:[#allocation2] sm:$0xff] %v921_v21  ;;  %v918_v24 = vadd.f32 %v1069_v23, %v1047_v22 }
 0x5b9   :  { %v922_v25 = vadd.f32 %v918_v24, %v1357_v14 }
 0x5bb   :  { %924 = vst [vmem:[#allocation2 + $0x8] sm:$0xff] %v922_v25 }
 0x5bc   :  { %1208 = shalt.err (!%p1205_p4)
}
 0x5bd   :  { %s1224_s6 = smov 128   ;;  %s1225_s19 = smov 8  }
 0x5be   :  { %936 = dma.vmem_to_hbm [thread:$0]  %s931_s0, 256, %s1585_s10, [#allocation3], %s1224_s6, %s1224_s6, %s1225_s19  }
 0x5bf   :  { %1217 = dma.done.wait [#allocation3], 256  }
 0x5c0   :  { %1218 = vsyncadd [#allocation3], 4294967040 }
 0x5c1   :  { %940 = vsyncpa [#allocation3], 1 }

// kernel: block_forward.5
= control target key start
LH: loop header
LB: loop body
LE: loop exit
PB: predicated region body
PF: predicated region fallthrough
CT: control target
= control target key end

     0   :  { %v1384_v0 = vmov 0.0   ;;  %vm1385_vm0 = vmmov 0   ;;  %vm76_vm1 = vcmask 261120   ;;  %vm498_vm2 = vcmask 523264   ;;  %s1835_s3 = inlined_call_operand.vmem [shape: bf16[5,32,128], index: 3, kind: input, shape index: {}]   ;;  %s1836_s0 = inlined_call_operand.vmem [shape: f32[5,16,32], index: 0, kind: input, shape index: {}]   ;;  %s1837_s6 = inlined_call_operand.vmem [shape: bf16[128,64], index: 6, kind: input, shape index: {}]   ;;  %s1838_s9 = inlined_call_operand.vmem [shape: bf16[128,128], index: 9, kind: input, shape index: {}]   ;;  %s1839_s4 = inlined_call_operand.vmem [shape: f32[5,1,128], index: 4, kind: input, shape index: {}]   ;;  %s1840_s2 = inlined_call_operand.vmem [shape: f32[16,128], index: 2, kind: input, shape index: {}]   ;;  %s1841_s1 = inlined_call_operand.vmem [shape: f32[16,128], index: 1, kind: input, shape index: {}]   ;;  %s1842_s7 = inlined_call_operand.vmem [shape: bf16[64,128], index: 7, kind: input, shape index: {}]   ;;  %s1843_s8 = inlined_call_operand.vmem [shape: bf16[128,128], index: 8, kind: input, shape index: {}]   ;;  %s1844_s10 = inlined_call_operand.vmem [shape: bf16[128,160], index: 10, kind: input, shape index: {}]   ;;  %s1845_s12 = inlined_call_operand.vmem [shape: f32[16,128], index: 12, kind: output, shape index: {0}]   ;;  %s1846_s11 = inlined_call_operand.vmem [shape: bf16[160,128], index: 11, kind: input, shape index: {}]   ;;  %s1847_s5 = inlined_call_operand.vmem [shape: f32[1,128], index: 5, kind: input, shape index: {}]   ;;  %s1848_s14 = inlined_call_operand.vmem [shape: f32[16,128], index: 14, kind: output, shape index: {2}]   ;;  %s1849_s13 = inlined_call_operand.vmem [shape: f32[16,128], index: 13, kind: output, shape index: {1}]   ;;  %s1850_s15 = inlined_call_operand.vmem [shape: f32[16,128], index: 15, kind: output, shape index: {3}]  }
   0x1   :  { %1195 = vmatprep.subr.bf16.mxu1 %v1384_v0  ;;  %v1302_v1 = vld [vmem:[%s1835_s3 + $0x8] sm:$0xff]   ;;  %1199 = vmatprep.mubr.msk.bf16.mxu1 %vm1385_vm0, %v1384_v0  ;;  %v1303_v2 = vld [vmem:[%s1835_s3] sm:$0xff]   ;;  %v1304_v5 = vld [vmem:[%s1835_s3 + $0x38] sm:$0xff]  }
   0x2   :  { %1211 = vmatprep.subr.bf16.mxu0 %v1384_v0  ;;  %1215 = vmatprep.mubr.msk.bf16.mxu0 %vm1385_vm0, %v1384_v0  ;;  %v50_v3 = vld [vmem:[%s1836_s0] sm:$0xff]  ;;  %v51_v4 = vld [vmem:[%s1836_s0 + $0x8] sm:$0xff]  ;;  %v1305_v6 = vld [vmem:[%s1835_s3 + $0x30] sm:$0xff]  }
   0x3   :  { %1196 = vmatpush3.bf16.msra.mxu1 %v1302_v1  ;;  %v1072_v7 = vld [vmem:[%s1836_s0 + $0x30] sm:$0xff]  ;;  %v52_v8 = vpack.c.bf16 %v51_v4, %v50_v3  ;;  %1212 = vmatpush3.bf16.msra.mxu0 %v1304_v5  ;;  %v1073_v9 = vld [vmem:[%s1836_s0 + $0x38] sm:$0xff]  ;;  %v1308_v13 = vld [vmem:[%s1837_s6 + $0x28] sm:$0xff]  }
   0x4   :  { %1197 = vmatprep.subr.bf16.mxu1 %v1384_v0  ;;  %1213 = vmatprep.subr.bf16.mxu0 %v1384_v0  ;;  %v205_v10 = vpack.c.bf16 %v1073_v9, %v1072_v7  ;;  %v1306_v11 = vld [vmem:[%s1837_s6 + $0x38] sm:$0xff]   ;;  %v1307_v12 = vld [vmem:[%s1837_s6 + $0x30] sm:$0xff]   ;;  %v1309_v14 = vld [vmem:[%s1837_s6 + $0x20] sm:$0xff]  }
   0x5   :  { %v1310_v15 = vld [vmem:[%s1837_s6 + $0x18] sm:$0xff]   ;;  %v1311_v16 = vld [vmem:[%s1837_s6 + $0x10] sm:$0xff]   ;;  %v1312_v17 = vld [vmem:[%s1837_s6 + $0x8] sm:$0xff]  }
   0x6   :  { %v1313_v18 = vld [vmem:[%s1837_s6] sm:$0xff]   ;;  %v1314_v19 = vld [vmem:[%s1835_s3 + $0x28] sm:$0xff]   ;;  %v1318_v48 = vld [vmem:[%s1838_s9 + $0x38] sm:$0xff]  }
   0x7   :  { %1198 = vmatpush3.bf16.msra.mxu1 %v1303_v2  ;;  %1214 = vmatpush3.bf16.msra.mxu0 %v1305_v6  ;;  %v1315_v20 = vld [vmem:[%s1835_s3 + $0x20] sm:$0xff]   ;;  %v1062_v22 = vld [vmem:[%s1836_s0 + $0x28] sm:$0xff]  ;;  %v1319_v50 = vld [vmem:[%s1838_s9 + $0x30] sm:$0xff]  }
   0x8   :  { %1203 = vmatprep.subr.bf16.mxu1 %v1384_v0  ;;  %1227 = vmatprep.subr.bf16.mxu0 %v1384_v0  ;;  %v1061_v21 = vld [vmem:[%s1836_s0 + $0x20] sm:$0xff]  ;;  %v1316_v24 = vld [vmem:[%s1835_s3 + $0x48] sm:$0xff]   ;;  %v1322_v53 = vld [vmem:[%s1838_s9 + $0x18] sm:$0xff]  }
   0x9   :  { %v128_v23 = vpack.c.bf16 %v1062_v22, %v1061_v21  ;;  %v1317_v25 = vld [vmem:[%s1835_s3 + $0x40] sm:$0xff]   ;;  %v1084_v27 = vld [vmem:[%s1836_s0 + $0x48] sm:$0xff]  ;;  %v1323_v57 = vld [vmem:[%s1838_s9 + $0x10] sm:$0xff]  }
   0xa   :  { %1200 = vmatmul.mubr.msk.bf16.vlgmr.msra.gmra.mxu1 %vm76_vm1, %v52_v8  ;;  %1216 = vmatmul.mubr.msk.bf16.vlgmr.msra.gmra.mxu0 %vm76_vm1, %v205_v10  ;;  %v1083_v26 = vld [vmem:[%s1836_s0 + $0x40] sm:$0xff]  ;;  %v1584_v35 = vld [vmem:[%s1840_s2 + $0x8] sm:$0xff]  ;;  %v1326_v2 = vld [vmem:[%s1842_s7 + $0x18] sm:$0xff]  }
   0xb   :  { %1207 = vmatprep.mubr.msk.bf16.mxu1 %vm1385_vm0, %v1384_v0  ;;  %1228 = vmatpush3.bf16.msra.mxu0 %v1306_v11  ;;  %v282_v28 = vpack.c.bf16 %v1084_v27, %v1083_v26  ;;  %v1057_v29 = vld [vmem:[%s1839_s4] ss:$0 sm:$0xff]  ;;  %v1595_v41 = vld [vmem:[%s1841_s1 + $0x8] sm:$0xff]  ;;  %v1079_v54 = vld [vmem:[%s1839_s4 + $0x3] ss:$0 sm:$0xff] }
   0xc   :  { %1243 = vmatprep.mubr.msk.bf16.mxu0 %vm1385_vm0, %v1384_v0  ;;  %1229 = vmatprep.subr.bf16.mxu0 %v1384_v0  ;;  %v1579_v32 = vld [vmem:[%s1840_s2] sm:$0xff]  ;;  %v1320_v51 = vld [vmem:[%s1838_s9 + $0x28] sm:$0xff]   ;;  %v1327_v3 = vld [vmem:[%s1842_s7 + $0x10] sm:$0xff]  }
   0xd   :  { %1204 = vmatpush3.bf16.msra.mxu1 %v1314_v19  ;;  %v1590_v40 = vld [vmem:[%s1841_s1] sm:$0xff]  ;;  %v1324_v60 = vld [vmem:[%s1838_s9 + $0x8] sm:$0xff]  }
   0xe   :  { %1205 = vmatprep.subr.bf16.mxu1 %v1384_v0  ;;  %v1321_v52 = vld [vmem:[%s1838_s9 + $0x20] sm:$0xff]   ;;  %v1328_v4 = vld [vmem:[%s1842_s7 + $0x8] sm:$0xff]  }
   0xf   :  { %1230 = vmatpush3.bf16.msra.mxu0 %v1307_v12  ;;  %v1325_v63 = vld [vmem:[%s1838_s9] sm:$0xff]  }
  0x10   :  { %1231 = vmatprep.subr.bf16.mxu0 %v1384_v0  ;;  %v1329_v5 = vld [vmem:[%s1842_s7] sm:$0xff]  }
  0x11   :  { %1206 = vmatpush3.bf16.msra.mxu1 %v1315_v20  ;;  %v1068_v6 = vld [vmem:[%s1839_s4 + $0x2] ss:$0 sm:$0xff] }
  0x12   :  { %1219 = vmatprep.subr.bf16.mxu1 %v1384_v0 }
  0x13   :  { %1232 = vmatpush3.bf16.msra.mxu0 %v1308_v13 }
  0x14   :  { %1233 = vmatprep.subr.bf16.mxu0 %v1384_v0  ;;  %1208 = vmatmul.mubr.msk.bf16.vlgmr.msra.gmra.mxu1 %vm76_vm1, %v128_v23 }
  0x15   :  { %1220 = vmatpush3.bf16.msra.mxu1 %v1316_v24  ;;  %1223 = vmatprep.mubr.msk.bf16.mxu1 %vm1385_vm0, %v1384_v0 }
  0x16   :  { %1221 = vmatprep.subr.bf16.mxu1 %v1384_v0 }
  0x17   :  { %1234 = vmatpush3.bf16.msra.mxu0 %v1309_v14 }
  0x18   :  { %1235 = vmatprep.subr.bf16.mxu0 %v1384_v0 }
  0x19   :  { %1222 = vmatpush3.bf16.msra.mxu1 %v1317_v25 }
  0x1a   :  { %1247 = vmatprep.subr.bf16.mxu1 %v1384_v0 }
  0x1b   :  { %1236 = vmatpush3.bf16.msra.mxu0 %v1310_v15 }
  0x1c   :  { %1237 = vmatprep.subr.bf16.mxu0 %v1384_v0  ;;  %1224 = vmatmul.mubr.msk.bf16.vlgmr.msra.gmra.mxu1 %vm76_vm1, %v282_v28 }
  0x1d   :  { %1255 = vmatprep.mubr.msk.bf16.mxu1 %vm1385_vm0, %v1384_v0  ;;  %1248 = vmatpush3.bf16.msra.mxu1 %v1326_v2  ;;  %v1362_v2 = vld [vmem:[%s1846_s11 + $0x38] sm:$0xff]  }
  0x1e   :  { %1249 = vmatprep.subr.bf16.mxu1 %v1384_v0 }
  0x1f   :  { %1238 = vmatpush3.bf16.msra.mxu0 %v1311_v16 }
  0x20   :  { %1239 = vmatprep.subr.bf16.mxu0 %v1384_v0 }
  0x21   :  { %1250 = vmatpush3.bf16.msra.mxu1 %v1327_v3  ;;  %v1363_v3 = vld [vmem:[%s1846_s11 + $0x30] sm:$0xff]  }
  0x22   :  { %1251 = vmatprep.subr.bf16.mxu1 %v1384_v0 }
  0x23   :  { %1240 = vmatpush3.bf16.msra.mxu0 %v1312_v17 }
  0x24   :  { %1241 = vmatprep.subr.bf16.mxu0 %v1384_v0 }
  0x25   :  { %1252 = vmatpush3.bf16.msra.mxu1 %v1328_v4  ;;  %v1364_v4 = vld [vmem:[%s1846_s11 + $0x28] sm:$0xff]  }
  0x26   :  { %1253 = vmatprep.subr.bf16.mxu1 %v1384_v0 }
  0x27   :  { %1242 = vmatpush3.bf16.msra.mxu0 %v1313_v18  ;;  %v1090_v18 = vld [vmem:[%s1839_s4 + $0x4] ss:$0 sm:$0xff] }
  0x28   :  { %1279 = vmatprep.subr.bf16.mxu0 %v1384_v0 }
  0x29   :  { %1254 = vmatpush3.bf16.msra.mxu1 %v1329_v5  ;;  %v1365_v5 = vld [vmem:[%s1846_s11 + $0x20] sm:$0xff]  }
  0x2a   :  { %1259 = vmatprep.subr.bf16.mxu1 %v1384_v0 }
  0xca   :  { %v114_v30 = vpop.f32.mrf.mxu1  ;;  %v268_v34 = vpop.f32.mrf.mxu0 }
  0xcb   :  { %v115_v31 = vadd.f32 %v1057_v29, %v114_v30  ;;  %v269_v55 = vadd.f32 %v1079_v54, %v268_v34  ;;  %v1386_v30 = vmov 0  }
  0xcc   :  { %v1201_v33 = vpop.f32.mrf.mxu1  ;;  %v1217_v39 = vpop.f32.mrf.mxu0 }
  0xcd   :  { %v121_v37 = vmul.f32 %v115_v31, %v1579_v32  ;;  %v275_v58 = vmul.f32 %v269_v55, %v1579_v32  ;;  %v1331_v39 = vld [vmem:[%s1843_s8 + $0x30] sm:$0xff]   ;;  %v1349_v55 = vld [vmem:[%s1844_s10 + $0x44] ss:$8 sps:$4 sm:$0xff]  }
  0xce   :  { %v117_v36 = vpop.f32.mrf.mxu1  ;;  %v271_v44 = vpop.f32.mrf.mxu0 }
  0xcf   :  { %v118_v38 = vadd.f32 %v1057_v29, %v117_v36  ;;  %v123_v45 = vadd.f32 %v121_v37, %v1590_v40  ;;  %v272_v56 = vadd.f32 %v1079_v54, %v271_v44  ;;  %v277_v61 = vadd.f32 %v275_v58, %v1590_v40  ;;  %v1344_v54 = vld [vmem:[%s1844_s10 + $0x50] ss:$8 sps:$4 sm:$0xff]  }
  0xd0   :  { %v1202_v42 = vpop.f32.mrf.mxu1  ;;  %v1218_v47 = vpop.f32.mrf.mxu0  ;;  %v1350_v58 = vld [vmem:[%s1844_s10 + $0x30] ss:$8 sps:$4 sm:$0xff]  }
  0xd1   :  { %v122_v43 = vmul.f32 %v118_v38, %v1584_v35  ;;  %v276_v59 = vmul.f32 %v272_v56, %v1584_v35  ;;  %v1347_v56 = vld [vmem:[%s1844_s10 + $0x40] ss:$8 sps:$4 sm:$0xff]  }
  0xd3   :  { %v124_v46 = vadd.f32 %v122_v43, %v1595_v41  ;;  %v278_v62 = vadd.f32 %v276_v59, %v1595_v41  ;;  %v1334_v43 = vld [vmem:[%s1843_s8 + $0x18] sm:$0xff]   ;;  %v1355_v59 = vld [vmem:[%s1844_s10 + $0x24] ss:$8 sps:$4 sm:$0xff]  }
  0xd4   :  { %v191_v7 = vpop.f32.mrf.mxu1 }
  0xd5   :  { %v357_v49 = vpack.c.bf16 %v124_v46, %v123_v45  ;;  %v661_v1 = vpack.c.bf16 %v278_v62, %v277_v61  ;;  %v192_v8 = vadd.f32 %v1068_v6, %v191_v7  ;;  %v1335_v46 = vld [vmem:[%s1843_s8 + $0x10] sm:$0xff]  }
  0xd6   :  { %v1209_v9 = vpop.f32.mrf.mxu1  ;;  %v1358_v61 = vld [vmem:[%s1844_s10 + $0x14] ss:$8 sps:$4 sm:$0xff]   ;;  %v1356_v62 = vld [vmem:[%s1844_s10 + $0x10] ss:$8 sps:$4 sm:$0xff]  }
  0xd7   :  { %1244 = vmatmul.mubr.bf16.vlgmr.msra.gmra.mxu0 %v357_v49  ;;  %v198_v10 = vmul.f32 %v192_v8, %v1579_v32  ;;  %v1337_v49 = vld [vmem:[%s1843_s8] sm:$0xff]   ;;  %v1367_v7 = vld [vmem:[%s1846_s11 + $0x10] sm:$0xff]   ;;  %v1368_v8 = vld [vmem:[%s1846_s11 + $0x8] sm:$0xff]  }
  0xd8   :  { %1280 = vmatpush3.bf16.msra.mxu0 %v1318_v48  ;;  %1295 = vmatprep.mubr.msk.bf16.mxu0 %vm1385_vm0, %v1384_v0  ;;  %v194_v11 = vpop.f32.mrf.mxu1  ;;  %v1336_v48 = vld [vmem:[%s1843_s8 + $0x8] sm:$0xff]   ;;  %v1369_v9 = vld [vmem:[%s1846_s11] sm:$0xff]  }
  0xd9   :  { %1281 = vmatprep.subr.bf16.mxu0 %v1384_v0  ;;  %v195_v12 = vadd.f32 %v1068_v6, %v194_v11  ;;  %v1661_v14 = vadd.f32 %v198_v10, %v1590_v40  ;;  %v1366_v6 = vld [vmem:[%s1846_s11 + $0x18] sm:$0xff]   ;;  %v1370_v10 = vld [vmem:[%s1846_s11 + $0x48] sm:$0xff]   ;;  %v1371_v11 = vld [vmem:[%s1846_s11 + $0x40] sm:$0xff]  }
  0xda   :  { %v1210_v13 = vpop.f32.mrf.mxu1 }
  0xdb   :  { %v199_v15 = vmul.f32 %v195_v12, %v1584_v35  ;;  %v1107_v12 = vld [vmem:[%s1847_s5] ss:$0 sm:$0xff] }
  0xdc   :  { %1282 = vmatpush3.bf16.msra.mxu0 %v1319_v50  ;;  %v345_v19 = vpop.f32.mrf.mxu1  ;;  %v1340_v50 = vld [vmem:[%s1844_s10 + $0x74] ss:$8 sps:$4 sm:$0xff]  }
  0xdd   :  { %1283 = vmatprep.subr.bf16.mxu0 %v1384_v0  ;;  %v1665_v16 = vadd.f32 %v199_v15, %v1595_v41  ;;  %v346_v20 = vadd.f32 %v1090_v18, %v345_v19 }
  0xde   :  { %v1225_v21 = vpop.f32.mrf.mxu1 }
  0xdf   :  { %v553_v17 = vpack.c.bf16 %v1665_v16, %v1661_v14  ;;  %v352_v22 = vmul.f32 %v346_v20, %v1579_v32 }
  0xe0   :  { %1284 = vmatpush3.bf16.msra.mxu0 %v1320_v51  ;;  %v348_v23 = vpop.f32.mrf.mxu1  ;;  %v1338_v51 = vld [vmem:[%s1844_s10 + $0x70] ss:$8 sps:$4 sm:$0xff]  }
  0xe1   :  { %1285 = vmatprep.subr.bf16.mxu0 %v1384_v0  ;;  %v349_v24 = vadd.f32 %v1090_v18, %v348_v23  ;;  %v1674_v26 = vadd.f32 %v352_v22, %v1590_v40  ;;  %v1332_v40 = vld [vmem:[%s1843_s8 + $0x28] sm:$0xff]  }
  0xe2   :  { %v1226_v25 = vpop.f32.mrf.mxu1 }
  0xe3   :  { %v353_v27 = vmul.f32 %v349_v24, %v1584_v35  ;;  %v1330_v35 = vld [vmem:[%s1843_s8 + $0x38] sm:$0xff]  }
  0xe4   :  { %1286 = vmatpush3.bf16.msra.mxu0 %v1321_v52  ;;  %v1343_v52 = vld [vmem:[%s1844_s10 + $0x64] ss:$8 sps:$4 sm:$0xff]  }
  0xe5   :  { %1287 = vmatprep.subr.bf16.mxu0 %v1384_v0  ;;  %v1678_v28 = vadd.f32 %v353_v27, %v1595_v41  ;;  %v1333_v41 = vld [vmem:[%s1843_s8 + $0x20] sm:$0xff]  }
  0xe7   :  { %v769_v29 = vpack.c.bf16 %v1678_v28, %v1674_v26 }
  0xe8   :  { %1288 = vmatpush3.bf16.msra.mxu0 %v1322_v53  ;;  %v1346_v53 = vld [vmem:[%s1844_s10 + $0x54] ss:$8 sps:$4 sm:$0xff]  }
  0xe9   :  { %1289 = vmatprep.subr.bf16.mxu0 %v1384_v0 }
  0xec   :  { %1290 = vmatpush3.bf16.msra.mxu0 %v1323_v57  ;;  %v1352_v57 = vld [vmem:[%s1844_s10 + $0x34] ss:$8 sps:$4 sm:$0xff]  }
  0xed   :  { %1291 = vmatprep.subr.bf16.mxu0 %v1384_v0 }
  0xf0   :  { %1292 = vmatpush3.bf16.msra.mxu0 %v1324_v60  ;;  %v1353_v60 = vld [vmem:[%s1844_s10 + $0x20] ss:$8 sps:$4 sm:$0xff]  }
  0xf1   :  { %1293 = vmatprep.subr.bf16.mxu0 %v1384_v0 }
  0xf4   :  { %1294 = vmatpush3.bf16.msra.mxu0 %v1325_v63  ;;  %v1361_v63 = vld [vmem:[%s1844_s10 + $0x4] ss:$8 sps:$4 sm:$0xff]  }
  0xf5   :  { %998 = vmatprep.subr.bf16.mxu0 %v1386_v30 }
  0xf7   :  { %1296 = vmatmul.mubr.bf16.vlgmr.msra.gmra.mxu0 %v661_v1  ;;  %v1359_v1 = vld [vmem:[%s1844_s10] ss:$8 sps:$4 sm:$0xff]  }
  0xf8   :  { %999 = vmatpush1.bf16.msra.mxu0 %v1362_v2 }
  0xf9   :  { %1000 = vmatprep.subr.bf16.mxu0 %v1386_v30 }
  0xfc   :  { %1001 = vmatpush1.bf16.msra.mxu0 %v1363_v3 }
  0xfd   :  { %1002 = vmatprep.subr.bf16.mxu0 %v1386_v30 }
 0x100   :  { %1003 = vmatpush1.bf16.msra.mxu0 %v1364_v4 }
 0x101   :  { %1004 = vmatprep.subr.bf16.mxu0 %v1386_v30 }
 0x104   :  { %1005 = vmatpush1.bf16.msra.mxu0 %v1365_v5 }
 0x105   :  { %1006 = vmatprep.subr.bf16.mxu0 %v1386_v30 }
 0x108   :  { %1007 = vmatpush1.bf16.msra.mxu0 %v1366_v6 }
 0x109   :  { %1008 = vmatprep.subr.bf16.mxu0 %v1386_v30 }
 0x10c   :  { %1009 = vmatpush1.bf16.msra.mxu0 %v1367_v7 }
 0x10d   :  { %1010 = vmatprep.subr.bf16.mxu0 %v1386_v30 }
 0x110   :  { %1011 = vmatpush1.bf16.msra.mxu0 %v1368_v8 }
 0x111   :  { %1012 = vmatprep.subr.bf16.mxu0 %v1386_v30 }
 0x114   :  { %1013 = vmatpush1.bf16.msra.mxu0 %v1369_v9 }
 0x115   :  { %1026 = vmatprep.subr.bf16.mxu0 %v1386_v30 }
 0x118   :  { %1027 = vmatpush2.bf16.msra.mxu0 %v1370_v10 }
 0x119   :  { %1028 = vmatprep.subr.bf16.mxu0 %v1386_v30 }
 0x11c   :  { %1029 = vmatpush2.bf16.msra.mxu0 %v1371_v11 }
 0x197   :  { %v456_v31 = vpop.f32.mrf.mxu0 }
 0x198   :  { %1372 = vtanh.f32 %v456_v31 }
 0x199   :  { %v1245_v33 = vpop.f32.mrf.mxu0 }
 0x19b   :  { %v459_v32 = vpop.f32.mrf.mxu0 }
 0x19c   :  { %1374 = vtanh.f32 %v459_v32 }
 0x19d   :  { %v1246_v34 = vpop.f32.mrf.mxu0 }
 0x1a5   :  { %v1373_v36 = vpop.eup %1372 }
 0x1a9   :  { %v1375_v37 = vpop.eup %1374 }
 0x1aa   :  { %v465_v38 = vpack.c.bf16 %v1375_v37, %v1373_v36 }
 0x1ac   :  { %1256 = vmatmul.mubr.msk.bf16.vlgmr.msra.gmra.mxu1 %vm498_vm2, %v465_v38 }
 0x1ad   :  { %1260 = vmatpush3.bf16.msra.mxu1 %v1330_v35  ;;  %1275 = vmatprep.mubr.msk.bf16.mxu1 %vm1385_vm0, %v1384_v0 }
 0x1ae   :  { %1261 = vmatprep.subr.bf16.mxu1 %v1384_v0 }
 0x1b1   :  { %1262 = vmatpush3.bf16.msra.mxu1 %v1331_v39 }
 0x1b2   :  { %1263 = vmatprep.subr.bf16.mxu1 %v1384_v0 }
 0x1b5   :  { %1264 = vmatpush3.bf16.msra.mxu1 %v1332_v40 }
 0x1b6   :  { %1265 = vmatprep.subr.bf16.mxu1 %v1384_v0 }
 0x1b7   :  { %v760_v42 = vpop.f32.mrf.mxu0 }
 0x1b8   :  { %767 = vst [vmem:[%s1845_s12] sm:$0xff] %v760_v42 }
 0x1b9   :  { %1266 = vmatpush3.bf16.msra.mxu1 %v1333_v41  ;;  %v1297_v44 = vpop.f32.mrf.mxu0 }
 0x1ba   :  { %1267 = vmatprep.subr.bf16.mxu1 %v1384_v0 }
 0x1bb   :  { %v763_v45 = vpop.f32.mrf.mxu0 }
 0x1bc   :  { %768 = vst [vmem:[%s1845_s12 + $0x8] sm:$0xff] %v763_v45 }
 0x1bd   :  { %1268 = vmatpush3.bf16.msra.mxu1 %v1334_v43  ;;  %v1298_v47 = vpop.f32.mrf.mxu0 }
 0x1be   :  { %1269 = vmatprep.subr.bf16.mxu1 %v1384_v0 }
 0x1c1   :  { %1270 = vmatpush3.bf16.msra.mxu1 %v1335_v46 }
 0x1c2   :  { %1271 = vmatprep.subr.bf16.mxu1 %v1384_v0 }
 0x1c5   :  { %1272 = vmatpush3.bf16.msra.mxu1 %v1336_v48 }
 0x1c6   :  { %1273 = vmatprep.subr.bf16.mxu1 %v1384_v0  ;;  %v1341_v0 = vld [vmem:[%s1844_s10 + $0x60] ss:$8 sps:$4 sm:$0xff]  }
 0x1c9   :  { %1274 = vmatpush3.bf16.msra.mxu1 %v1337_v49 }
 0x1ca   :  { %866 = vmatprep.subr.bf16.mxu1 %v1340_v50 }
 0x1cc   :  { %1276 = vmatmul.mubr.bf16.vlgmr.msra.gmra.mxu1 %v553_v17 }
 0x1cd   :  { %867 = vmatpush1.bf16.msra.mxu1 %v1338_v51  ;;  %898 = vmatprep.mubr.bf16.mxu1 %v1386_v30 }
 0x1ce   :  { %868 = vmatprep.subr.bf16.mxu1 %v1343_v52 }
 0x1d1   :  { %869 = vmatpush1.bf16.msra.mxu1 %v1341_v0 }
 0x1d2   :  { %870 = vmatprep.subr.bf16.mxu1 %v1346_v53 }
 0x1d5   :  { %871 = vmatpush1.bf16.msra.mxu1 %v1344_v54 }
 0x1d6   :  { %872 = vmatprep.subr.bf16.mxu1 %v1349_v55 }
 0x1d9   :  { %873 = vmatpush1.bf16.msra.mxu1 %v1347_v56 }
 0x1da   :  { %874 = vmatprep.subr.bf16.mxu1 %v1352_v57 }
 0x1dd   :  { %875 = vmatpush1.bf16.msra.mxu1 %v1350_v58 }
 0x1de   :  { %876 = vmatprep.subr.bf16.mxu1 %v1355_v59 }
 0x1e1   :  { %877 = vmatpush1.bf16.msra.mxu1 %v1353_v60 }
 0x1e2   :  { %878 = vmatprep.subr.bf16.mxu1 %v1358_v61 }
 0x1e5   :  { %879 = vmatpush1.bf16.msra.mxu1 %v1356_v62 }
 0x1e6   :  { %880 = vmatprep.subr.bf16.mxu1 %v1361_v63 }
 0x1e9   :  { %881 = vmatpush1.bf16.msra.mxu1 %v1359_v1 }
 0x1ec   :  { %899 = vmatmul.mubr.bf16.vlgmr.msra.gmra.mxu1 %v769_v29 }
 0x26c   :  { %v536_v13 = vpop.f32.mrf.mxu1 }
 0x26d   :  { %v549_v14 = vadd.f32 %v1107_v12, %v536_v13 }
 0x26e   :  { %v1257_v15 = vpop.f32.mrf.mxu1 }
 0x26f   :  { %551 = vst [vmem:[%s1848_s14] sm:$0xff] %v549_v14 }
 0x270   :  { %v539_v16 = vpop.f32.mrf.mxu1 }
 0x271   :  { %v550_v17 = vadd.f32 %v1107_v12, %v539_v16 }
 0x272   :  { %v1258_v18 = vpop.f32.mrf.mxu1 }
 0x273   :  { %552 = vst [vmem:[%s1848_s14 + $0x8] sm:$0xff] %v550_v17 }
 0x28c   :  { %v652_v19 = vpop.f32.mrf.mxu1 }
 0x28d   :  { %659 = vst [vmem:[%s1849_s13] sm:$0xff] %v652_v19 }
 0x28e   :  { %v1277_v20 = vpop.f32.mrf.mxu1 }
 0x290   :  { %v655_v21 = vpop.f32.mrf.mxu1 }
 0x291   :  { %660 = vst [vmem:[%s1849_s13 + $0x8] sm:$0xff] %v655_v21 }
 0x292   :  { %v1278_v22 = vpop.f32.mrf.mxu1 }
 0x2ac   :  { %v900_v23 = vpop.f32.mrf.mxu1 }
 0x2ae   :  { %v902_v24 = vpop.f32.mrf.mxu1 }
 0x2af   :  { %1376 = vtanh.f32 %v902_v24 }
 0x2b0   :  { %v904_v25 = vpop.f32.mrf.mxu1 }
 0x2b1   :  { %1378 = vtanh.f32 %v904_v25 }
 0x2b2   :  { %v906_v26 = vpop.f32.mrf.mxu1 }
 0x2b3   :  { %1380 = vtanh.f32 %v906_v26 }
 0x2b4   :  { %1382 = vtanh.f32 %v900_v23 }
 0x2bc   :  { %v1377_v27 = vpop.eup %1376 }
 0x2be   :  { %v1379_v28 = vpop.eup %1378 }
 0x2c0   :  { %v1381_v29 = vpop.eup %1380 }
 0x2c1   :  { %v1383_v30 = vpop.eup %1382  ;;  %v914_v31 = vpack.c.bf16 %v1381_v29, %v1377_v27 }
 0x2c2   :  { %v913_v33 = vpack.c.bf16 %v1379_v28, %v1383_v30 }
 0x2c3   :  { %1150 = vmatprep.mubr.msk.bf16.mxu0 %vm76_vm1, %v914_v31 }
 0x2c4   :  { %1031 = vmatmul.mubr.bf16.vlgmr.msra.gmra.mxu0 %v913_v33 }
 0x384   :  { %v1032_v32 = vpop.f32.mrf.mxu0 }
 0x385   :  { %1039 = vst [vmem:[%s1850_s15] sm:$0xff] %v1032_v32 }
 0x386   :  { %v1034_v34 = vpop.f32.mrf.mxu0 }
 0x388   :  { %v1035_v36 = vpop.f32.mrf.mxu0 }
 0x389   :  { %1040 = vst [vmem:[%s1850_s15 + $0x8] sm:$0xff] %v1035_v36 }
 0x38a   :  { %v1037_v37 = vpop.f32.mrf.mxu0 }

// kernel: block_forward.6
= control target key start
LH: loop header
LB: loop body
LE: loop exit
PB: predicated region body
PF: predicated region fallthrough
CT: control target
= control target key end

     0   :  { %s1847_s15 = smov 0   ;;  %s1849_s16 = smov 0   ;;  %s2118_s0 = inlined_call_operand.vmem [shape: f32[2,8,128], index: 0, kind: input, shape index: {}]   ;;  %s2119_s1 = inlined_call_operand.vmem [shape: f32[2,8,128], index: 1, kind: input, shape index: {}]   ;;  %s2120_s2 = inlined_call_operand.vmem [shape: f32[2,8,128], index: 2, kind: input, shape index: {}]   ;;  %s2121_s3 = inlined_call_operand.vmem [shape: f32[2,64], index: 3, kind: input, shape index: {}]   ;;  %s2122_s4 = inlined_call_operand.vmem [shape: f32[2,8,128], index: 4, kind: output, shape index: {}]  }
   0x1   :  { %s1851_s17 = smov 0  }
   0x2 LB: > { %s26_s18 = sadd.s32 1, %s1813_s16  ;;  %p1556_p0 = scmp.ge.s32.totalorder %s1817_s17, 1  ;;  %s1817_s17 = sphi %s1851_s17, %s14_s17   ;;  %s1813_s16 = sphi %s1849_s16, %s2124_s16   ;;  %s1809_s15 = sphi %s1847_s15, %s2123_s15  }
   0x3   : > { %p28_p1 = scmp.ge.s32.totalorder %s26_s18, 2  ;;  %p208_p2 = scmp.lt.s32.totalorder %s1817_s17, 3 }
   0x5   : > { %s2126_s18 = smov (%p28_p1, %s26_s18), 0  ;;  %p209_p3 = pnand %p1556_p0, %p208_p2 }
   0x6   : > { %p252_p4 = scmp.lt.s32.totalorder (!%p209_p3), %s1809_s15, 1  ;;  %s1821_s23 = smov (!%p209_p3), 64  }
   0x7   : > { %212 = sbr.rel (%p209_p3) target bundleno = 1255 (0x4e7), region = 36 }
   0xc   : > { %v1819_v0 = vmov 0.0   ;;  %vm1820_vm0 = vmmov 0   ;;  %s2128_s15 = smov (!%p252_p4, %s1809_s15), 1  ;;  %v305_v3 = vlaneseq  ;;  %vm316_vm2 = vcmask 64512  }
   0xd   : > { %1654 = vmatprep.subr.mxu1 %v1819_v0  ;;  %1656 = vmatprep.mubr.msk.f32.mxu1 %vm1820_vm0, %v1819_v0  ;;  %s1868_s19 = sshll.u32 %s2128_s15, 3  ;;  %vm284_vm3 = vcmask 523264  }
   0xe   : > { %s272_s22 = scalar_lea.vmem %s2120_s2, %s1868_s19  ;;  %v1877_v4 = vshrl.u32 %v305_v3, 7  ;;  %v1879_v5 = vand.u32 127, %v305_v3  ;;  %s265_s26 = scalar_lea.vmem %s2119_s1, %s1868_s19  ;;  %285 = vst.msk [vmem:[#allocation2] sm:$0xff] %vm284_vm3, %v1819_v0  ;;  %286 = vst.msk [vmem:[#allocation2 + $0x8] sm:$0xff] %vm284_vm3, %v1819_v0 }
   0xf   : > { %v1874_v1 = vld [vmem:[%s272_s22] sm:$0xff]  ;;  %287 = vst.msk [vmem:[#allocation2 + $0x10] sm:$0xff] %vm284_vm3, %v1819_v0  ;;  %288 = vst.msk [vmem:[#allocation2 + $0x18] sm:$0xff] %vm284_vm3, %v1819_v0  ;;  %s258_s29 = scalar_lea.vmem %s2118_s0, %s1868_s19  ;;  %s279_s8 = scalar_lea.vmem %s2122_s4, %s1868_s19 }
  0x10   : > { %v313_v2 = vmul.f32 1.442695, %v1874_v1  ;;  %vm309_vm1 = vcmp.le.s32.totalorder %v1879_v5, %v1877_v4  ;;  %v1896_v9 = vld [vmem:[%s265_s26] sm:$0xff]  ;;  %289 = vst.msk [vmem:[#allocation2 + $0x20] sm:$0xff] %vm284_vm3, %v1819_v0  ;;  %290 = vst.msk [vmem:[#allocation2 + $0x28] sm:$0xff] %vm284_vm3, %v1819_v0  ;;  %v1935_v12 = vsub.s32 7, %v1877_v4  ;;  %vm312_vm4 = vcmp.gt.s32.totalorder %v1877_v4, %v1879_v5 }
  0x11   : > { %v1884_v8 = vsel %vm309_vm1, 1.0, %v1819_v0  ;;  %291 = vst.msk [vmem:[#allocation2 + $0x30] sm:$0xff] %vm284_vm3, %v1819_v0  ;;  %292 = vst.msk [vmem:[#allocation2 + $0x38] sm:$0xff] %vm284_vm3, %v1819_v0  ;;  %v1943_v30 = vld [vmem:[%s258_s29] sm:$0xff] }
  0x12   : > { %1777 = vpow2.f32 %v313_v2  ;;  %293 = vst.msk [vmem:[#allocation2 + $0x40] sm:$0xff] %vm284_vm3, %v1819_v0  ;;  %294 = vst.msk [vmem:[#allocation2 + $0x48] sm:$0xff] %vm284_vm3, %v1819_v0 }
  0x13   : > { %295 = vst.msk [vmem:[#allocation2 + $0x50] sm:$0xff] %vm284_vm3, %v1819_v0  ;;  %296 = vst.msk [vmem:[#allocation2 + $0x58] sm:$0xff] %vm284_vm3, %v1819_v0 }
  0x14   : > { %297 = vst.msk [vmem:[#allocation2 + $0x60] sm:$0xff] %vm284_vm3, %v1819_v0  ;;  %298 = vst.msk [vmem:[#allocation2 + $0x68] sm:$0xff] %vm284_vm3, %v1819_v0 }
  0x15   : > { %299 = vst.msk [vmem:[#allocation2 + $0x70] sm:$0xff] %vm284_vm3, %v1819_v0  ;;  %300 = vst.msk [vmem:[#allocation2 + $0x78] sm:$0xff] %vm284_vm3, %v1819_v0  ;;  %v1974_v39 = vld [vmem:[#allocation2 + $0x8] sm:$0xff]  ;;  %v1978_v40 = vld [vmem:[#allocation2] sm:$0xff] }
  0x16   : > { %v394_v44 = vld [vmem:[#allocation2 + $0x18] sm:$0xff]  ;;  %v393_v51 = vld [vmem:[#allocation2 + $0x10] sm:$0xff] }
  0x17   : > { %v396_v55 = vld [vmem:[#allocation2 + $0x28] sm:$0xff]  ;;  %v395_v60 = vld [vmem:[#allocation2 + $0x20] sm:$0xff] }
  0x18   : > { %v398_v49 = vld [vmem:[#allocation2 + $0x38] sm:$0xff]  ;;  %v397_v58 = vld [vmem:[#allocation2 + $0x30] sm:$0xff] }
  0x1a   : > { %v940_v5 = vld [vmem:[#allocation2 + $0x58] sm:$0xff] }
  0x1f   : > { %v1778_v6 = vpop.eup %1777 }
  0x20   : > { %v315_v7 = vsub.f32 0.0, %v1778_v6 }
  0x22   : > { %1655 = vmatpush3.msra.mxu1 %v315_v7  ;;  %862 = vrot.lane.b32.xlu0 %v315_v7, %s1821_s23 }
  0x23   : > { %1657 = vmatmul.mubr.msk.f32.vlgmr.msra.gmra.mxu1 %vm316_vm2, %v1884_v8  ;;  %1659 = vmatprep.subr.mxu1 %v1819_v0 }
  0x24   : > { %1661 = vmatprep.mubr.msk.f32.mxu1 %vm1820_vm0, %v1819_v0 }
  0x40   : > { %684 = vxpose.xlu0.b32.start.end [1/1] (short) (narrow) %v1896_v9, 64 }
  0x94   : > { %v1931_v10 = vpop.permute.xlu0 %862 }
  0xbc   : > { %v700_v11 = vpop.trf.xlu0 }
  0xbd   : > { %1690 = vmatprep.mubr.msk.f32.mxu0 %vm316_vm2, %v700_v11 }
  0xc0   : > { %v701_v13 = vpop.trf.xlu0 }
  0xc4   : > { %v702_v22 = vpop.trf.xlu0 }
  0xc8   : > { %v703_v24 = vpop.trf.xlu0 }
  0xcc   : > { %v704_v25 = vpop.trf.xlu0 }
  0xd0   : > { %v705_v32 = vpop.trf.xlu0 }
  0xd4   : > { %v706_v34 = vpop.trf.xlu0 }
  0xd8   : > { %v707_v35 = vpop.trf.xlu0 }
  0xe3   : > { %v386_v14 = vpop.f32.mrf.mxu1 }
  0xe4   : > { %v390_v15 = vsub.f32 %v386_v14, %v315_v7  ;;  %v402_v16 = vsub.f32 0.0, %v386_v14  ;;  %v665_v17 = vrot.slane %v386_v14, %v1935_v12  ;;  %v670_v36 = vmul.f32 1.442695, %v386_v14 }
  0xe5   : > { %v1658_v18 = vpop.f32.mrf.mxu1 }
  0xe6   : > { %v399_v19 = vmul.f32 1.442695, %v390_v15  ;;  %v403_v20 = vmul.f32 1.442695, %v402_v16  ;;  %v666_v21 = vsub.f32 %v665_v17, %v386_v14 }
  0xe8   : > { %1779 = vpow2.f32 %v399_v19  ;;  %v667_v23 = vmul.f32 1.442695, %v666_v21 }
  0xe9   : > { %1781 = vpow2.f32 %v403_v20 }
  0xea   : > { %1783 = vpow2.f32 %v667_v23 }
  0xeb   : > { %1785 = vpow2.f32 %v670_v36 }
  0xf5   : > { %v1780_v26 = vpop.eup %1779 }
  0xf6   : > { %v1782_v27 = vpop.eup %1781  ;;  %v1948_v33 = vmul.f32 %v1780_v26, %v1943_v30 }
  0xf7   : > { %v1784_v28 = vpop.eup %1783  ;;  %v405_v29 = vmul.f32 %v1782_v27, %v1874_v1 }
  0xf8   : > { %v669_v31 = vmul.f32 %v1784_v28, %v1874_v1  ;;  %v1786_v37 = vpop.eup %1785 }
  0xf9   : > { %1660 = vmatpush3.xpose.msk.msra.mxu1 %vm284_vm3, %v405_v29  ;;  %v675_v38 = vrot.slane %v1786_v37, %v1935_v12 }
  0xfa   : > { %1688 = vmatprep.subr.mxu0 %v669_v31  ;;  %1664 = vmatprep.subr.mxu1 %v1819_v0 }
  0xfb   : > { %1689 = vmatpush3.msra.mxu0 %v669_v31  ;;  %v677_v41 = vmul.f32 %v675_v38, %v1974_v39  ;;  %v676_v47 = vmul.f32 %v675_v38, %v1978_v40  ;;  %v679_v53 = vmul.f32 %v675_v38, %v394_v44  ;;  %v678_v57 = vmul.f32 %v675_v38, %v393_v51 }
  0xfc   : > { %1662 = vmatmul.mubr.msk.f32.vlgmr.msra.gmra.mxu1 %vm284_vm3, %v1948_v33  ;;  %1691 = vmatmul.mubr.msk.f32.vlgmr.msra.gmra.mxu0 %vm316_vm2, %v701_v13  ;;  %v681_v62 = vmul.f32 %v675_v38, %v396_v55  ;;  %v680_v3 = vmul.f32 %v675_v38, %v395_v60  ;;  %v682_v14 = vmul.f32 %v675_v38, %v397_v58 }
  0xfd   : > { %1702 = vmatprep.subr.mxu0 %v1819_v0  ;;  %1693 = vmatprep.mubr.msk.f32.mxu0 %vm316_vm2, %v702_v22 }
  0xfe   : > { %1703 = vmatpush3.msra.mxu0 %v1931_v10  ;;  %1665 = vmatpush3.msra.mxu1 %v1896_v9 }
  0xff   : > { %1666 = vmatprep.mubr.msk.f32.mxu1 %vm1820_vm0, %v1819_v0  ;;  %1669 = vmatprep.subr.mxu1 %v1819_v0 }
 0x100   : > { %1694 = vmatmul.mubr.msk.f32.gmra.mxu0 %vm316_vm2, %v703_v24  ;;  %1707 = vmatprep.subr.mxu0 %v1819_v0 }
 0x101   : > { %1696 = vmatprep.mubr.msk.f32.mxu0 %vm316_vm2, %v704_v25 }
 0x104   : > { %1697 = vmatmul.mubr.msk.f32.gmra.mxu0 %vm316_vm2, %v705_v32  ;;  %v1120_v32 = vsub.s32 1, %v1877_v4 }
 0x105   : > { %1699 = vmatprep.mubr.msk.f32.mxu0 %vm316_vm2, %v706_v34 }
 0x108   : > { %1700 = vmatmul.mubr.msk.f32.gmra.mxu0 %vm316_vm2, %v707_v35 }
 0x109   : > { %1704 = vmatprep.mubr.msk.f32.mxu0 %vm1820_vm0, %v1819_v0 }
 0x10c   : > { %1705 = vmatmul.mubr.msk.f32.vlgmr.msra.gmra.mxu0 %vm316_vm2, %v1884_v8  ;;  %v683_v8 = vmul.f32 %v675_v38, %v398_v49 }
 0x10d   : > { %1709 = vmatprep.mubr.msk.f32.mxu0 %vm1820_vm0, %v1819_v0 }
 0x1bc   : > { %v479_v42 = vpop.f32.mrf.mxu1  ;;  %v1692_v43 = vpop.f32.mrf.mxu0 }
 0x1bd   : > { %v483_v45 = vsel %vm312_vm4, %v479_v42, 0.0  ;;  %v846_v46 = vadd.f32 %v1692_v43, %v677_v41 }
 0x1be   : > { %v1663_v48 = vpop.f32.mrf.mxu1  ;;  %1667 = vmatmul.mubr.msk.f32.vlgmr.msra.gmra.mxu1 %vm316_vm2, %v483_v45  ;;  %v806_v50 = vpop.f32.mrf.mxu0 }
 0x1bf   : > { %854 = vst.msk [vmem:[#allocation2 + $0x8] sm:$0xff] %vm284_vm3, %v846_v46  ;;  %1670 = vmatpush3.xpose.msk.msra.mxu1 %vm284_vm3, %v398_v49  ;;  %v845_v52 = vadd.f32 %v806_v50, %v676_v47  ;;  %1685 = vmatprep.mubr.msk.f32.mxu1 %vm1820_vm0, %v1819_v0  ;;  %v559_v49 = vsub.s32 0, %v1877_v4  ;;  %v941_v4 = vld [vmem:[#allocation2 + $0x60] sm:$0xff] }
 0x1c0   : > { %1671 = vmatprep.subr.mxu1 %v1819_v0  ;;  %v1695_v54 = vpop.f32.mrf.mxu0 }
 0x1c1   : > { %853 = vst.msk [vmem:[#allocation2] sm:$0xff] %vm284_vm3, %v845_v52  ;;  %v848_v56 = vadd.f32 %v1695_v54, %v679_v53 }
 0x1c2   : > { %v816_v59 = vpop.f32.mrf.mxu0 }
 0x1c3   : > { %856 = vst.msk [vmem:[#allocation2 + $0x18] sm:$0xff] %vm284_vm3, %v848_v56  ;;  %1672 = vmatpush3.xpose.msk.msra.mxu1 %vm284_vm3, %v397_v58  ;;  %v847_v61 = vadd.f32 %v816_v59, %v678_v57 }
 0x1c4   : > { %1673 = vmatprep.subr.mxu1 %v1819_v0  ;;  %v1698_v63 = vpop.f32.mrf.mxu0 }
 0x1c5   : > { %855 = vst.msk [vmem:[#allocation2 + $0x10] sm:$0xff] %vm284_vm3, %v847_v61  ;;  %v850_v2 = vadd.f32 %v1698_v63, %v681_v62 }
 0x1c6   : > { %v826_v6 = vpop.f32.mrf.mxu0 }
 0x1c7   : > { %858 = vst.msk [vmem:[#allocation2 + $0x28] sm:$0xff] %vm284_vm3, %v850_v2  ;;  %1674 = vmatpush3.xpose.msk.msra.mxu1 %vm284_vm3, %v396_v55  ;;  %v849_v7 = vadd.f32 %v826_v6, %v680_v3  ;;  %v944_v6 = vld [vmem:[#allocation2 + $0x78] sm:$0xff] }
 0x1c8   : > { %1675 = vmatprep.subr.mxu1 %v1819_v0  ;;  %v1701_v11 = vpop.f32.mrf.mxu0 }
 0x1c9   : > { %857 = vst.msk [vmem:[#allocation2 + $0x20] sm:$0xff] %vm284_vm3, %v849_v7  ;;  %v852_v13 = vadd.f32 %v1701_v11, %v683_v8  ;;  %v943_v7 = vld [vmem:[#allocation2 + $0x70] sm:$0xff]  ;;  %v942_v8 = vld [vmem:[#allocation2 + $0x68] sm:$0xff] }
 0x1ca   : > { %v836_v15 = vpop.f32.mrf.mxu0  ;;  %v939_v11 = vld [vmem:[#allocation2 + $0x50] sm:$0xff] }
 0x1cb   : > { %860 = vst.msk [vmem:[#allocation2 + $0x38] sm:$0xff] %vm284_vm3, %v852_v13  ;;  %1676 = vmatpush3.xpose.msk.msra.mxu1 %vm284_vm3, %v395_v60  ;;  %v851_v16 = vadd.f32 %v836_v15, %v682_v14  ;;  %v938_v13 = vld [vmem:[#allocation2 + $0x48] sm:$0xff]  ;;  %v937_v14 = vld [vmem:[#allocation2 + $0x40] sm:$0xff] }
 0x1cc   : > { %1677 = vmatprep.subr.mxu1 %v1819_v0  ;;  %v2003_v17 = vpop.f32.mrf.mxu0 }
 0x1cd   : > { %859 = vst.msk [vmem:[#allocation2 + $0x30] sm:$0xff] %vm284_vm3, %v851_v16  ;;  %v952_v18 = vsub.f32 0.0, %v2003_v17  ;;  %v935_v19 = vsub.f32 %v2003_v17, %v1931_v10  ;;  %v1238_v24 = vrot.slane %v2003_v17, %v1935_v12 }
 0x1ce   : > { %v1706_v20 = vpop.f32.mrf.mxu0 }
 0x1cf   : > { %v953_v21 = vmul.f32 1.442695, %v952_v18  ;;  %1678 = vmatpush3.xpose.msk.msra.mxu1 %vm284_vm3, %v394_v44  ;;  %v945_v22 = vmul.f32 1.442695, %v935_v19  ;;  %v1239_v25 = vsub.f32 %v1238_v24, %v2003_v17  ;;  %v1247_v18 = vmul.f32 1.442695, %v2003_v17 }
 0x1d0   : > { %1679 = vmatprep.subr.mxu1 %v1819_v0 }
 0x1d1   : > { %1787 = vpow2.f32 %v953_v21  ;;  %v1240_v26 = vmul.f32 1.442695, %v1239_v25 }
 0x1d2   : > { %1789 = vpow2.f32 %v945_v22 }
 0x1d3   : > { %1680 = vmatpush3.xpose.msk.msra.mxu1 %vm284_vm3, %v393_v51  ;;  %1791 = vpow2.f32 %v1240_v26 }
 0x1d4   : > { %1681 = vmatprep.subr.mxu1 %v1819_v0  ;;  %1793 = vpow2.f32 %v1247_v18 }
 0x1d7   : > { %1682 = vmatpush3.xpose.msk.msra.mxu1 %vm284_vm3, %v1974_v39 }
 0x1d8   : > { %1683 = vmatprep.subr.mxu1 %v1819_v0 }
 0x1db   : > { %1684 = vmatpush3.xpose.msk.msra.mxu1 %vm284_vm3, %v1978_v40 }
 0x1de   : > { %1686 = vmatmul.mubr.msk.f32.vlgmr.msra.gmra.mxu1 %vm284_vm3, %v1948_v33  ;;  %v1788_v10 = vpop.eup %1787  ;;  %v304_v33 = vld [vmem:[%s2121_s3] sm:$0x3] }
 0x1df   : > { %956 = vrot.lane.b32.xlu1 %v1788_v10, %s1821_s23  ;;  %v1790_v23 = vpop.eup %1789  ;;  %v1121_v35 = vrot.slane %v304_v33, %v1120_v32  ;;  %v560_v50 = vrot.slane %v304_v33, %v559_v49 }
 0x1e0   : > { %v1792_v34 = vpop.eup %1791 }
 0x1e1   : > { %v561_v52 = vmul.f32 %v560_v50, %v1943_v30  ;;  %v1794_v19 = vpop.eup %1793 }
 0x1e2   : > { %v1252_v20 = vrot.slane %v1794_v19, %v1935_v12 }
 0x1e3   : > { %948 = vrot.lane.b32.xlu1 %v1790_v23, %s1821_s23  ;;  %v562_v54 = vmul.f32 %v561_v52, %v1874_v1 }
 0x1e4   : > { %v1254_v21 = vmul.f32 %v1252_v20, %v938_v13  ;;  %v1253_v10 = vmul.f32 %v1252_v20, %v937_v14  ;;  %v1256_v25 = vmul.f32 %v1252_v20, %v940_v5  ;;  %v1258_v12 = vmul.f32 %v1252_v20, %v942_v8 }
 0x1e5   : > { %v563_v58 = vsel %vm284_vm3, %v562_v54, 0.0  ;;  %v1257_v33 = vmul.f32 %v1252_v20, %v941_v4 }
 0x251   : > { %v957_v27 = vpop.permute.xlu1 %956 }
 0x252   : > { %v959_v28 = vmul.f32 %v957_v27, %v1874_v1 }
 0x254   : > { %964 = vrot.lane.b32.xlu1 %v959_v28, %s1821_s23  ;;  %v1255_v28 = vmul.f32 %v1252_v20, %v939_v11 }
 0x255   : > { %v949_v29 = vpop.permute.xlu1 %948 }
 0x256   : > { %v951_v31 = vmul.f32 %v949_v29, %v1943_v30 }
 0x258   : > { %961 = vrot.lane.b32.xlu1 %v951_v31, %s1821_s23 }
 0x25c   : > { %1042 = vrot.lane.b32.xlu1 %v1896_v9, %s1821_s23 }
 0x260   : > { %1243 = vrot.lane.b32.xlu1 %v1792_v34, %s1821_s23 }
 0x264   : > { %1123 = vrot.lane.b32.xlu1 %v1121_v35, %s1821_s23 }
 0x27e   : > { %v553_v36 = vpop.f32.mrf.mxu1 }
 0x280   : > { %v1668_v37 = vpop.f32.mrf.mxu1 }
 0x29e   : > { %v656_v38 = vpop.f32.mrf.mxu1 }
 0x29f   : > { %v2037_v39 = vadd.f32 %v656_v38, %v553_v36  ;;  %v1260_v36 = vmul.f32 %v1252_v20, %v944_v6 }
 0x2a0   : > { %v1687_v40 = vpop.f32.mrf.mxu1 }
 0x2a1   : > { %v1259_v40 = vmul.f32 %v1252_v20, %v943_v7 }
 0x2c6   : > { %v965_v41 = vpop.permute.xlu1 %964 }
 0x2c7   : > { %1708 = vmatpush3.xpose.msk.msra.mxu0 %vm284_vm3, %v965_v41 }
 0x2c8   : > { %1712 = vmatprep.subr.mxu0 %v1819_v0 }
 0x2ca   : > { %v2041_v42 = vpop.permute.xlu1 %961 }
 0x2cb   : > { %1710 = vmatmul.mubr.msk.f32.vlgmr.msra.gmra.mxu0 %vm284_vm3, %v2041_v42 }
 0x2cc   : > { %1714 = vmatprep.mubr.msk.f32.mxu0 %vm1820_vm0, %v1819_v0 }
 0x2ce   : > { %v1043_v43 = vpop.permute.xlu1 %1042 }
 0x2cf   : > { %1261 = vxpose.xlu0.b32.start.end [1/1] (short) (narrow) %v1043_v43, 64  ;;  %1713 = vmatpush3.msra.mxu0 %v1043_v43 }
 0x2d0   : > { %1717 = vmatprep.subr.mxu0 %v1819_v0 }
 0x2d2   : > { %v1244_v44 = vpop.permute.xlu1 %1243 }
 0x2d3   : > { %v1246_v45 = vmul.f32 %v1244_v44, %v1874_v1 }
 0x2d5   : > { %1294 = vrot.lane.b32.xlu1 %v1246_v45, %s1821_s23 }
 0x2d6   : > { %v1124_v46 = vpop.permute.xlu1 %1123 }
 0x2d7   : > { %v1126_v47 = vmul.f32 %v1124_v46, %v1943_v30 }
 0x2d9   : > { %v1127_v48 = vmul.f32 %v1126_v47, %v1874_v1 }
 0x2db   : > { %1129 = vrot.lane.b32.xlu1 %v1127_v48, %s1821_s23 }
 0x347   : > { %v1295_v51 = vpop.permute.xlu1 %1294 }
 0x348   : > { %1736 = vmatprep.subr.mxu1 %v1295_v51 }
 0x349   : > { %1737 = vmatpush3.msra.mxu1 %v1295_v51 }
 0x34b   : > { %v1277_v53 = vpop.trf.xlu0 }
 0x34c   : > { %1738 = vmatprep.mubr.msk.f32.mxu1 %vm316_vm2, %v1277_v53 }
 0x34d   : > { %v1130_v55 = vpop.permute.xlu1 %1129 }
 0x34e   : > { %v1132_v56 = vsel %vm284_vm3, %v1130_v55, 0.0 }
 0x34f   : > { %v1278_v57 = vpop.trf.xlu0  ;;  %1133 = vadd.xlane.f32.xlu1 %v1132_v56 }
 0x350   : > { %1739 = vmatmul.mubr.msk.f32.vlgmr.msra.gmra.mxu1 %vm316_vm2, %v1278_v57 }
 0x353   : > { %v1279_v59 = vpop.trf.xlu0  ;;  %564 = vadd.xlane.f32.xlu1 %v563_v58 }
 0x354   : > { %1741 = vmatprep.mubr.msk.f32.mxu1 %vm316_vm2, %v1279_v59 }
 0x357   : > { %v1280_v30 = vpop.trf.xlu0 }
 0x358   : > { %1742 = vmatmul.mubr.msk.f32.gmra.mxu1 %vm316_vm2, %v1280_v30 }
 0x35b   : > { %v1281_v60 = vpop.trf.xlu0 }
 0x35c   : > { %1744 = vmatprep.mubr.msk.f32.mxu1 %vm316_vm2, %v1281_v60 }
 0x35f   : > { %v1282_v1 = vpop.trf.xlu0 }
 0x360   : > { %1745 = vmatmul.mubr.msk.f32.gmra.mxu1 %vm316_vm2, %v1282_v1 }
 0x363   : > { %v1283_v61 = vpop.trf.xlu0 }
 0x364   : > { %1747 = vmatprep.mubr.msk.f32.mxu1 %vm316_vm2, %v1283_v61 }
 0x367   : > { %v1284_v62 = vpop.trf.xlu0 }
 0x368   : > { %1748 = vmatmul.mubr.msk.f32.gmra.mxu1 %vm316_vm2, %v1284_v62 }
 0x38b   : > { %v1036_v63 = vpop.f32.mrf.mxu0 }
 0x38c   : > { %v1040_v2 = vsel %vm312_vm4, %v1036_v63, 0.0 }
 0x38d   : > { %v1711_v3 = vpop.f32.mrf.mxu0  ;;  %1715 = vmatmul.mubr.msk.f32.vlgmr.msra.gmra.mxu0 %vm316_vm2, %v1040_v2 }
 0x38e   : > { %1718 = vmatpush3.xpose.msk.msra.mxu0 %vm284_vm3, %v944_v6  ;;  %1733 = vmatprep.mubr.msk.f32.mxu0 %vm1820_vm0, %v1819_v0 }
 0x38f   : > { %1719 = vmatprep.subr.mxu0 %v1819_v0 }
 0x392   : > { %1720 = vmatpush3.xpose.msk.msra.mxu0 %vm284_vm3, %v943_v7 }
 0x393   : > { %1721 = vmatprep.subr.mxu0 %v1819_v0 }
 0x396   : > { %1722 = vmatpush3.xpose.msk.msra.mxu0 %vm284_vm3, %v942_v8 }
 0x397   : > { %1723 = vmatprep.subr.mxu0 %v1819_v0 }
 0x39a   : > { %1724 = vmatpush3.xpose.msk.msra.mxu0 %vm284_vm3, %v941_v4 }
 0x39b   : > { %1725 = vmatprep.subr.mxu0 %v1819_v0 }
 0x39e   : > { %1726 = vmatpush3.xpose.msk.msra.mxu0 %vm284_vm3, %v940_v5 }
 0x39f   : > { %1727 = vmatprep.subr.mxu0 %v1819_v0 }
 0x3a2   : > { %1728 = vmatpush3.xpose.msk.msra.mxu0 %vm284_vm3, %v939_v11 }
 0x3a3   : > { %1729 = vmatprep.subr.mxu0 %v1819_v0 }
 0x3a6   : > { %1730 = vmatpush3.xpose.msk.msra.mxu0 %vm284_vm3, %v938_v13 }
 0x3a7   : > { %1731 = vmatprep.subr.mxu0 %v1819_v0 }
 0x3aa   : > { %1732 = vmatpush3.xpose.msk.msra.mxu0 %vm284_vm3, %v937_v14 }
 0x3ad   : > { %1734 = vmatmul.mubr.msk.f32.vlgmr.msra.gmra.mxu0 %vm284_vm3, %v2041_v42 }
 0x3d8   : > { %v1134_v15 = vpop.xlane.xlu1 %1133 }
 0x3d9   : > { %v1229_v16 = vmul.f32 %v1134_v15, %v1896_v9 }
 0x3db   : > { %1231 = vrot.lane.b32.xlu0 %v1229_v16, %s1821_s23 }
 0x3dc   : > { %v565_v50 = vpop.xlane.xlu1 %564 }
 0x3dd   : > { %v660_v51 = vmul.f32 %v565_v50, %v1896_v9 }
 0x3df   : > { %v661_v52 = vadd.f32 %v660_v51, %v2037_v39 }
 0x410   : > { %v1740_v22 = vpop.f32.mrf.mxu1 }
 0x411   : > { %v1427_v0 = vadd.f32 %v1740_v22, %v1254_v21 }
 0x412   : > { %v1387_v23 = vpop.f32.mrf.mxu1 }
 0x413   : > { %1435 = vst.msk [vmem:[#allocation2 + $0x48] sm:$0xff] %vm284_vm3, %v1427_v0  ;;  %v1426_v24 = vadd.f32 %v1387_v23, %v1253_v10 }
 0x415   : > { %1434 = vst.msk [vmem:[#allocation2 + $0x40] sm:$0xff] %vm284_vm3, %v1426_v24 }
 0x418   : > { %v1743_v26 = vpop.f32.mrf.mxu1 }
 0x419   : > { %v1429_v27 = vadd.f32 %v1743_v26, %v1256_v25 }
 0x41a   : > { %v1397_v29 = vpop.f32.mrf.mxu1 }
 0x41b   : > { %1437 = vst.msk [vmem:[#allocation2 + $0x58] sm:$0xff] %vm284_vm3, %v1429_v27  ;;  %v1428_v17 = vadd.f32 %v1397_v29, %v1255_v28 }
 0x41d   : > { %1436 = vst.msk [vmem:[#allocation2 + $0x50] sm:$0xff] %vm284_vm3, %v1428_v17 }
 0x420   : > { %v1746_v31 = vpop.f32.mrf.mxu1 }
 0x421   : > { %v1431_v32 = vadd.f32 %v1746_v31, %v1258_v12 }
 0x422   : > { %v1407_v34 = vpop.f32.mrf.mxu1 }
 0x423   : > { %1439 = vst.msk [vmem:[#allocation2 + $0x68] sm:$0xff] %vm284_vm3, %v1431_v32  ;;  %v1430_v35 = vadd.f32 %v1407_v34, %v1257_v33 }
 0x425   : > { %1438 = vst.msk [vmem:[#allocation2 + $0x60] sm:$0xff] %vm284_vm3, %v1430_v35 }
 0x428   : > { %v1749_v37 = vpop.f32.mrf.mxu1 }
 0x429   : > { %v1433_v38 = vadd.f32 %v1749_v37, %v1260_v36 }
 0x42a   : > { %v1417_v41 = vpop.f32.mrf.mxu1 }
 0x42b   : > { %1441 = vst.msk [vmem:[#allocation2 + $0x78] sm:$0xff] %vm284_vm3, %v1433_v38  ;;  %v1432_v42 = vadd.f32 %v1417_v41, %v1259_v40 }
 0x42d   : > { %1440 = vst.msk [vmem:[#allocation2 + $0x70] sm:$0xff] %vm284_vm3, %v1432_v42 }
 0x44d   : > { %v1114_v43 = vpop.f32.mrf.mxu0  ;;  %v1232_v46 = vpop.permute.xlu0 %1231 }
 0x44f   : > { %v1716_v44 = vpop.f32.mrf.mxu0 }
 0x46d   : > { %v1225_v45 = vpop.f32.mrf.mxu0 }
 0x46e   : > { %v1226_v47 = vadd.f32 %v1225_v45, %v1114_v43 }
 0x46f   : > { %v1735_v48 = vpop.f32.mrf.mxu0 }
 0x470   : > { %v1234_v49 = vadd.f32 %v1232_v46, %v1226_v47 }
 0x472   : > { %1443 = vrot.lane.b32.xlu1 %v1234_v49, %s1821_s23 }
 0x4e4   : > { %v1444_v53 = vpop.permute.xlu1 %1443 }
 0x4e5   : > { %v1446_v54 = vsel %vm284_vm3, %v661_v52, %v1444_v53 }
 0x4e6   : > { %1447 = vst [vmem:[%s279_s8] sm:$0xff] %v1446_v54 }
 0x4e7 PF: > { %s14_s17 = sadd.s32 1, %s1817_s17   ;;  %s2123_s15 = smov %s1813_s16 }
 0x4e8   : > { %p11_p5 = scmp.ge.s32.totalorder %s14_s17, 4   ;;  %s2124_s16 = smov %s2126_s18 }
 0x4ea   :  { %13 = sbr.rel (!%p11_p5) target bundleno = 2 (0x2), region = 77 }

</bundles_post_ra>
